<compile_context>
chip_gen: v7x
topology: tpu7x:2x2x1
jax: 0.10.0
libtpu: 0.0.40
codegen_flags: <defaults>
</compile_context>

<pallas_src>
import jax
import jax.numpy as jnp
from jax import lax
from jax.experimental import pallas as pl
from jax.experimental.pallas import tpu as pltpu


# ----------------------------------------------------------------------------
# Pallas kernel: single grid step, full batch.
# All sequence data is TIME-MAJOR and flattened:  row = t * B + b.
# ----------------------------------------------------------------------------
def moe_kernel(
    # inputs
    mel_ref,      # (T*B, n_mels)   time-major
    text_ref,     # (B, text_dim)
    feats_ref,    # (T*B, feat_dim) time-major
    loop_ref,     # (B, 3)
    flags_ref,    # (B, 2)
    rtmean_ref,   # (B, T*B)  per-batch mean-over-time operator (one matmul)
    # weights
    wa_ref, ba_ref,               # audio expert
    wt_ref, bt_ref,               # text expert
    wc_ref, bc_ref,               # tabular expert
    wd_ref, bd_ref,               # loop expert
    wg1_ref, bg1_ref,             # gate layer 1
    wg2_ref, bg2_ref,             # gate layer 2
    wihf_ref, whhf_ref, bf_ref,   # LSTM forward
    wihb_ref, whhb_ref, bb_ref,   # LSTM backward
    wregf_ref,                    # (T*H, T) block-diag regressor (fwd half)
    wregb_ref,                    # (T*H, T) block-diag regressor (bwd half)
    breg_ref,                     # (1, 1)
    # outputs
    y_ref,        # (B, T)   lane-dense
    gw_ref,       # (B, 4)
):
    f32 = jnp.float32
    B = text_ref.shape[0]
    TB = mel_ref.shape[0]
    T = TB // B
    H = whhf_ref.shape[0]

    relu = lambda x: jnp.maximum(x, 0.0)
    dot = lambda a, b: jnp.dot(a, b, preferred_element_type=f32)

    def tile_rows(x):
        # (B, F) -> (T*B, F) with row t*B+b == x[b]   (sublane concat only)
        return jnp.concatenate([x] * T, axis=0)

    # ---------------- experts (all B*T rows in one matmul each) -------------
    eA = relu(dot(mel_ref[...], wa_ref[...]) + ba_ref[...])     # (T*B, E)
    eC = relu(dot(feats_ref[...], wc_ref[...]) + bc_ref[...])   # (T*B, E)
    eT = relu(dot(text_ref[...], wt_ref[...]) + bt_ref[...])    # (B, E)
    eD = relu(dot(loop_ref[...], wd_ref[...]) + bd_ref[...])    # (B, E)

    # ---------------- gating (whole batch at once) ---------------------------
    audio_summary = dot(rtmean_ref[...], eA)                    # (B, E) mean over T
    gate_in = jnp.concatenate([audio_summary, flags_ref[...]], axis=1)  # (B, E+2)
    g1 = relu(dot(gate_in, wg1_ref[...]) + bg1_ref[...])
    logits = dot(g1, wg2_ref[...]) + bg2_ref[...]               # (B, 4)
    logits = logits - jnp.max(logits, axis=1, keepdims=True)
    ex = jnp.exp(logits)
    w = ex * pl.reciprocal(jnp.sum(ex, axis=1, keepdims=True), approx=True)
    gw_ref[...] = w                                             # (B, 4)

    # ---------------- fuse experts (time-major rows) -------------------------
    w_rows = tile_rows(w)                                       # (T*B, 4)
    static_part = w[:, 1:2] * eT + w[:, 3:4] * eD               # (B, E)
    fused = (w_rows[:, 0:1] * eA + w_rows[:, 2:3] * eC
             + tile_rows(static_part))                          # (T*B, E)

    # ---------------- BiLSTM -------------------------------------------------
    # Hoisted input projections: two (T*B, E)@(E, 4H) matmuls instead of
    # 2*T rank-B ones inside the recurrence.
    pre_f = dot(fused, wihf_ref[...]) + bf_ref[...]             # (T*B, 4H)
    pre_b = dot(fused, wihb_ref[...]) + bb_ref[...]             # (T*B, 4H)
    whh_f = whhf_ref[...]
    whh_b = whhb_ref[...]

    def cell(pre_t, h, c, whh):
        # PyTorch gate order: i, f, g, o
        gates = pre_t + dot(h, whh)                             # (B, 4H)
        i_g = jax.nn.sigmoid(gates[:, 0:H])
        f_g = jax.nn.sigmoid(gates[:, H:2 * H])
        g_g = jnp.tanh(gates[:, 2 * H:3 * H])
        o_g = jax.nn.sigmoid(gates[:, 3 * H:4 * H])
        c_new = f_g * c + i_g * g_g
        return o_g * jnp.tanh(c_new), c_new

    zero = jnp.zeros((B, H), f32)
    h_f, c_f, h_b, c_b = zero, zero, zero, zero
    hf_cols = [None] * T
    hb_cols = [None] * T
    # Fully-unrolled, interleaved fwd/bwd recurrence (independent chains ->
    # the scheduler overlaps the two per-step matmuls).  Static slices only.
    for i in range(T):
        tb = T - 1 - i
        h_f, c_f = cell(pre_f[i * B:(i + 1) * B, :], h_f, c_f, whh_f)
        h_b, c_b = cell(pre_b[tb * B:(tb + 1) * B, :], h_b, c_b, whh_b)
        hf_cols[i] = h_f
        hb_cols[tb] = h_b

    seq_f = jnp.concatenate(hf_cols, axis=1)                    # (B, T*H)
    seq_b = jnp.concatenate(hb_cols, axis=1)                    # (B, T*H)

    # ---------------- regressor: lane-dense (B, T) in one shot ---------------
    y_ref[...] = (dot(seq_f, wregf_ref[...])
                  + dot(seq_b, wregb_ref[...])
                  + breg_ref[...])


# ----------------------------------------------------------------------------
# Wrapper: layout plumbing (transposes / broadcasts) stays in plain JAX.
# ----------------------------------------------------------------------------
def moe_forward(mel, text_emb, raw_feats, loop_feats, has_lyrics, has_loop, params):
    f32 = jnp.float32
    B, T, n_mels = mel.shape
    feat_dim = raw_feats.shape[2]
    H = params["whh_f"].shape[0]
    TB = T * B

    flags = jnp.stack([has_lyrics, has_loop], axis=1).astype(f32)       # (B, 2)

    # Time-major flattening: each LSTM timestep is a contiguous (B, .) row block.
    mel_tm = jnp.transpose(mel, (1, 0, 2)).reshape(TB, n_mels)
    feats_tm = jnp.transpose(raw_feats, (1, 0, 2)).reshape(TB, feat_dim)

    # (B, T*B) operator: mean over time of a time-major (T*B, E) matrix.
    rt_mean = jnp.tile(jnp.eye(B, dtype=f32), (1, T)) / float(T)

    # Block-diagonal regressor weights: (B, T*H) hidden lanes -> (B, T) output.
    wreg = params["wreg"]                                               # (2H, 1)
    wreg_f_blk = jnp.kron(jnp.eye(T, dtype=f32), wreg[0:H, :])          # (T*H, T)
    wreg_b_blk = jnp.kron(jnp.eye(T, dtype=f32), wreg[H:2 * H, :])      # (T*H, T)

    weight_list = [
        params["wa"], params["ba"], params["wt"], params["bt"],
        params["wc"], params["bc"], params["wd"], params["bd"],
        params["wg1"], params["bg1"], params["wg2"], params["bg2"],
        params["wih_f"], params["whh_f"], params["b_f"],
        params["wih_b"], params["whh_b"], params["b_b"],
        wreg_f_blk, wreg_b_blk, params["breg"],
    ]

    in_arrays = [mel_tm, text_emb, feats_tm, loop_feats, flags, rt_mean] + weight_list
    full2 = lambda i: (0, 0)
    in_specs = [pl.BlockSpec(a.shape, full2) for a in in_arrays]

    out_specs = [
        pl.BlockSpec((B, T), full2),
        pl.BlockSpec((B, 4), full2),
    ]
    out_shape = [
        jax.ShapeDtypeStruct((B, T), f32),
        jax.ShapeDtypeStruct((B, 4), f32),
    ]

    y2d, w = pl.pallas_call(
        moe_kernel,
        grid=(1,),                          # whole batch in one step (B is tiny);
        in_specs=in_specs,                  # for large B: batch-tile + "parallel"
        out_specs=out_specs,
        out_shape=out_shape,
        compiler_params=pltpu.CompilerParams(dimension_semantics=("arbitrary",)),
    )(*in_arrays)

    y_hat = y2d[:, :, None]                                            # (B, T, 1)
    gate_weights = jnp.broadcast_to(w[:, None, :], (B, T, 4))          # (B, T, 4)
    return y_hat, gate_weights


# ----------------------------------------------------------------------------
# Pure-JAX reference (for numerical verification)
# ----------------------------------------------------------------------------
def reference_forward(mel, text_emb, raw_feats, loop_feats, has_lyrics, has_loop, p):
    relu = lambda x: jnp.maximum(x, 0.0)
    B, T, _ = mel.shape
    H = p["whh_f"].shape[0]

    eA = relu(mel @ p["wa"] + p["ba"])                       # (B,T,E)
    eT = relu(text_emb @ p["wt"] + p["bt"])[:, None, :]      # (B,1,E)
    eC = relu(raw_feats @ p["wc"] + p["bc"])                 # (B,T,E)
    eD = relu(loop_feats @ p["wd"] + p["bd"])[:, None, :]    # (B,1,E)

    audio_summary = eA.mean(axis=1)
    flags = jnp.stack([has_lyrics, has_loop], axis=1).astype(jnp.float32)
    gate_in = jnp.concatenate([audio_summary, flags], axis=1)
    logits = relu(gate_in @ p["wg1"] + p["bg1"]) @ p["wg2"] + p["bg2"]
    w = jax.nn.softmax(logits, axis=1)                       # (B,4)

    fused = (w[:, 0:1, None] * eA + w[:, 1:2, None] * eT
             + w[:, 2:3, None] * eC + w[:, 3:4, None] * eD)  # (B,T,E)

    def cell(x_t, h, c, wih, whh, bias):
        g = x_t @ wih + h @ whh + bias
        i = jax.nn.sigmoid(g[:, 0:H]); f = jax.nn.sigmoid(g[:, H:2 * H])
        gg = jnp.tanh(g[:, 2 * H:3 * H]); o = jax.nn.sigmoid(g[:, 3 * H:4 * H])
        c = f * c + i * gg
        h = o * jnp.tanh(c)
        return h, c

    def scan_dir(x_seq, wih, whh, bias):
        def step(carry, x_t):
            h, c = carry
            h, c = cell(x_t, h, c, wih, whh, bias)
            return (h, c), h
        h0 = jnp.zeros((B, H), jnp.float32)
        c0 = jnp.zeros((B, H), jnp.float32)
        _, hs = lax.scan(step, (h0, c0), jnp.swapaxes(x_seq, 0, 1))
        return jnp.swapaxes(hs, 0, 1)

    h_f = scan_dir(fused, p["wih_f"], p["whh_f"], p["b_f"])
    h_b = scan_dir(fused[:, ::-1, :], p["wih_b"], p["whh_b"], p["b_b"])[:, ::-1, :]
    seq = jnp.concatenate([h_f, h_b], axis=-1)
    y = seq @ p["wreg"] + p["breg"]
    gw = jnp.broadcast_to(w[:, None, :], (B, T, 4))
    return y, gw


# ----------------------------------------------------------------------------
# Deterministic parameter construction
# ----------------------------------------------------------------------------
def make_params(key, n_mels, feat_dim, text_dim, expert_dim, gate_hidden, lstm_hidden):
    names_shapes = [
        ("wa", (n_mels, expert_dim)), ("ba", (1, expert_dim)),
        ("wt", (text_dim, expert_dim)), ("bt", (1, expert_dim)),
        ("wc", (feat_dim, expert_dim)), ("bc", (1, expert_dim)),
        ("wd", (3, expert_dim)), ("bd", (1, expert_dim)),
        ("wg1", (expert_dim + 2, gate_hidden)), ("bg1", (1, gate_hidden)),
        ("wg2", (gate_hidden, 4)), ("bg2", (1, 4)),
        ("wih_f", (expert_dim, 4 * lstm_hidden)), ("whh_f", (lstm_hidden, 4 * lstm_hidden)),
        ("b_f", (1, 4 * lstm_hidden)),
        ("wih_b", (expert_dim, 4 * lstm_hidden)), ("whh_b", (lstm_hidden, 4 * lstm_hidden)),
        ("b_b", (1, 4 * lstm_hidden)),
        ("wreg", (2 * lstm_hidden, 1)), ("breg", (1, 1)),
    ]
    keys = jax.random.split(key, len(names_shapes))
    return {
        name: (0.1 * jax.random.normal(k, shape, dtype=jnp.float32))
        for k, (name, shape) in zip(keys, names_shapes)
    }


if __name__ == "__main__":
    # small, module-consistent shapes
    B, T = 2, 8
    n_mels, feat_dim, text_dim = 16, 12, 32
    expert_dim, gate_hidden, lstm_hidden = 32, 32, 16

    root = jax.random.PRNGKey(0)
    k_mel, k_txt, k_feat, k_loop, k_fl1, k_fl2, k_par = jax.random.split(root, 7)

    mel = jax.random.normal(k_mel, (B, T, n_mels), dtype=jnp.float32)
    text_emb = jax.random.normal(k_txt, (B, text_dim), dtype=jnp.float32)
    raw_feats = jax.random.normal(k_feat, (B, T, feat_dim), dtype=jnp.float32)
    loop_feats = jax.random.normal(k_loop, (B, 3), dtype=jnp.float32)
    has_lyrics = (jax.random.uniform(k_fl1, (B,)) > 0.5).astype(jnp.float32)
    has_loop = (jax.random.uniform(k_fl2, (B,)) > 0.5).astype(jnp.float32)

    params = make_params(k_par, n_mels, feat_dim, text_dim,
                         expert_dim, gate_hidden, lstm_hidden)

    y_hat, gate_weights = moe_forward(
        mel, text_emb, raw_feats, loop_feats, has_lyrics, has_loop, params)
    jax.block_until_ready((y_hat, gate_weights))

    assert y_hat.shape == (B, T, 1), y_hat.shape
    assert gate_weights.shape == (B, T, 4), gate_weights.shape

    y_ref, gw_ref = reference_forward(
        mel, text_emb, raw_feats, loop_feats, has_lyrics, has_loop, params)
    jax.block_until_ready((y_ref, gw_ref))

    import numpy as np
    np.testing.assert_allclose(np.asarray(y_hat), np.asarray(y_ref), rtol=5e-3, atol=5e-3)
    np.testing.assert_allclose(np.asarray(gate_weights), np.asarray(gw_ref), rtol=5e-3, atol=5e-3)

    print("KERNEL_OK")
</pallas_src>

<mosaic_0001>
module attributes {stable_mosaic.version = 11 : i64} {
  func.func @moe_kernel(%arg0: i32, %arg1: memref<16x16xf32, #tpu.memory_space<vmem>>, %arg2: memref<2x32xf32, #tpu.memory_space<vmem>>, %arg3: memref<16x12xf32, #tpu.memory_space<vmem>>, %arg4: memref<2x3xf32, #tpu.memory_space<vmem>>, %arg5: memref<2x2xf32, #tpu.memory_space<vmem>>, %arg6: memref<2x16xf32, #tpu.memory_space<vmem>>, %arg7: memref<16x32xf32, #tpu.memory_space<vmem>>, %arg8: memref<1x32xf32, #tpu.memory_space<vmem>>, %arg9: memref<32x32xf32, #tpu.memory_space<vmem>>, %arg10: memref<1x32xf32, #tpu.memory_space<vmem>>, %arg11: memref<12x32xf32, #tpu.memory_space<vmem>>, %arg12: memref<1x32xf32, #tpu.memory_space<vmem>>, %arg13: memref<3x32xf32, #tpu.memory_space<vmem>>, %arg14: memref<1x32xf32, #tpu.memory_space<vmem>>, %arg15: memref<34x32xf32, #tpu.memory_space<vmem>>, %arg16: memref<1x32xf32, #tpu.memory_space<vmem>>, %arg17: memref<32x4xf32, #tpu.memory_space<vmem>>, %arg18: memref<1x4xf32, #tpu.memory_space<vmem>>, %arg19: memref<32x64xf32, #tpu.memory_space<vmem>>, %arg20: memref<16x64xf32, #tpu.memory_space<vmem>>, %arg21: memref<1x64xf32, #tpu.memory_space<vmem>>, %arg22: memref<32x64xf32, #tpu.memory_space<vmem>>, %arg23: memref<16x64xf32, #tpu.memory_space<vmem>>, %arg24: memref<1x64xf32, #tpu.memory_space<vmem>>, %arg25: memref<128x8xf32, #tpu.memory_space<vmem>>, %arg26: memref<128x8xf32, #tpu.memory_space<vmem>>, %arg27: memref<1x1xf32, #tpu.memory_space<vmem>>, %arg28: memref<2x8xf32, #tpu.memory_space<vmem>>, %arg29: memref<2x4xf32, #tpu.memory_space<vmem>>) attributes {dimension_semantics = [#tpu.dimension_semantics<arbitrary>], iteration_bounds = array<i64: 1>, scalar_prefetch = 0 : i64, scratch_operands = 0 : i64, tpu.core_type = #tpu.core_type<tc>, window_params = [{pipeline_mode = #tpu.pipeline_mode<synchronous>, transform_indices = @transform_0, window_bounds = array<i64: 16, 16>}, {pipeline_mode = #tpu.pipeline_mode<synchronous>, transform_indices = @transform_1, window_bounds = array<i64: 2, 32>}, {pipeline_mode = #tpu.pipeline_mode<synchronous>, transform_indices = @transform_2, window_bounds = array<i64: 16, 12>}, {pipeline_mode = #tpu.pipeline_mode<synchronous>, transform_indices = @transform_3, window_bounds = array<i64: 2, 3>}, {pipeline_mode = #tpu.pipeline_mode<synchronous>, transform_indices = @transform_4, window_bounds = array<i64: 2, 2>}, {pipeline_mode = #tpu.pipeline_mode<synchronous>, transform_indices = @transform_5, window_bounds = array<i64: 2, 16>}, {pipeline_mode = #tpu.pipeline_mode<synchronous>, transform_indices = @transform_6, window_bounds = array<i64: 16, 32>}, {pipeline_mode = #tpu.pipeline_mode<synchronous>, transform_indices = @transform_7, window_bounds = array<i64: 1, 32>}, {pipeline_mode = #tpu.pipeline_mode<synchronous>, transform_indices = @transform_8, window_bounds = array<i64: 32, 32>}, {pipeline_mode = #tpu.pipeline_mode<synchronous>, transform_indices = @transform_9, window_bounds = array<i64: 1, 32>}, {pipeline_mode = #tpu.pipeline_mode<synchronous>, transform_indices = @transform_10, window_bounds = array<i64: 12, 32>}, {pipeline_mode = #tpu.pipeline_mode<synchronous>, transform_indices = @transform_11, window_bounds = array<i64: 1, 32>}, {pipeline_mode = #tpu.pipeline_mode<synchronous>, transform_indices = @transform_12, window_bounds = array<i64: 3, 32>}, {pipeline_mode = #tpu.pipeline_mode<synchronous>, transform_indices = @transform_13, window_bounds = array<i64: 1, 32>}, {pipeline_mode = #tpu.pipeline_mode<synchronous>, transform_indices = @transform_14, window_bounds = array<i64: 34, 32>}, {pipeline_mode = #tpu.pipeline_mode<synchronous>, transform_indices = @transform_15, window_bounds = array<i64: 1, 32>}, {pipeline_mode = #tpu.pipeline_mode<synchronous>, transform_indices = @transform_16, window_bounds = array<i64: 32, 4>}, {pipeline_mode = #tpu.pipeline_mode<synchronous>, transform_indices = @transform_17, window_bounds = array<i64: 1, 4>}, {pipeline_mode = #tpu.pipeline_mode<synchronous>, transform_indices = @transform_18, window_bounds = array<i64: 32, 64>}, {pipeline_mode = #tpu.pipeline_mode<synchronous>, transform_indices = @transform_19, window_bounds = array<i64: 16, 64>}, {pipeline_mode = #tpu.pipeline_mode<synchronous>, transform_indices = @transform_20, window_bounds = array<i64: 1, 64>}, {pipeline_mode = #tpu.pipeline_mode<synchronous>, transform_indices = @transform_21, window_bounds = array<i64: 32, 64>}, {pipeline_mode = #tpu.pipeline_mode<synchronous>, transform_indices = @transform_22, window_bounds = array<i64: 16, 64>}, {pipeline_mode = #tpu.pipeline_mode<synchronous>, transform_indices = @transform_23, window_bounds = array<i64: 1, 64>}, {pipeline_mode = #tpu.pipeline_mode<synchronous>, transform_indices = @transform_24, window_bounds = array<i64: 128, 8>}, {pipeline_mode = #tpu.pipeline_mode<synchronous>, transform_indices = @transform_25, window_bounds = array<i64: 128, 8>}, {pipeline_mode = #tpu.pipeline_mode<synchronous>, transform_indices = @transform_26, window_bounds = array<i64: 1, 1>}, {pipeline_mode = #tpu.pipeline_mode<synchronous>, transform_indices = @transform_27, window_bounds = array<i64: 2, 8>}, {pipeline_mode = #tpu.pipeline_mode<synchronous>, transform_indices = @transform_28, window_bounds = array<i64: 2, 4>}]} {
    %c0 = arith.constant 0 : index
    %c0_0 = arith.constant 0 : index
    %0 = vector.load %arg1[%c0, %c0_0] : memref<16x16xf32, #tpu.memory_space<vmem>>, vector<16x16xf32>
    %c0_1 = arith.constant 0 : index
    %c0_2 = arith.constant 0 : index
    %1 = vector.load %arg7[%c0_1, %c0_2] : memref<16x32xf32, #tpu.memory_space<vmem>>, vector<16x32xf32>
    %cst = arith.constant dense<0.000000e+00> : vector<16x32xf32>
    %2 = tpu.matmul %0, %1, %cst {dimension_numbers = #tpu.dot_dimension_numbers<[1], [0], [0], [1], [0, 0, 1, 1], [], []>} : vector<16x16xf32>, vector<16x32xf32>, vector<16x32xf32> -> vector<16x32xf32>
    %c0_3 = arith.constant 0 : index
    %c0_4 = arith.constant 0 : index
    %3 = vector.load %arg8[%c0_3, %c0_4] : memref<1x32xf32, #tpu.memory_space<vmem>>, vector<1x32xf32>
    %4 = vector.broadcast %3 : vector<1x32xf32> to vector<16x32xf32>
    %5 = arith.addf %2, %4 : vector<16x32xf32>
    %cst_5 = arith.constant 0.000000e+00 : f32
    %6 = vector.broadcast %cst_5 : f32 to vector<16x32xf32>
    %7 = arith.maximumf %5, %6 : vector<16x32xf32>
    %c0_6 = arith.constant 0 : index
    %c0_7 = arith.constant 0 : index
    %8 = vector.load %arg3[%c0_6, %c0_7] : memref<16x12xf32, #tpu.memory_space<vmem>>, vector<16x12xf32>
    %c0_8 = arith.constant 0 : index
    %c0_9 = arith.constant 0 : index
    %9 = vector.load %arg11[%c0_8, %c0_9] : memref<12x32xf32, #tpu.memory_space<vmem>>, vector<12x32xf32>
    %cst_10 = arith.constant dense<0.000000e+00> : vector<16x32xf32>
    %10 = tpu.matmul %8, %9, %cst_10 {dimension_numbers = #tpu.dot_dimension_numbers<[1], [0], [0], [1], [0, 0, 1, 1], [], []>} : vector<16x12xf32>, vector<12x32xf32>, vector<16x32xf32> -> vector<16x32xf32>
    %c0_11 = arith.constant 0 : index
    %c0_12 = arith.constant 0 : index
    %11 = vector.load %arg12[%c0_11, %c0_12] : memref<1x32xf32, #tpu.memory_space<vmem>>, vector<1x32xf32>
    %12 = vector.broadcast %11 : vector<1x32xf32> to vector<16x32xf32>
    %13 = arith.addf %10, %12 : vector<16x32xf32>
    %cst_13 = arith.constant 0.000000e+00 : f32
    %14 = vector.broadcast %cst_13 : f32 to vector<16x32xf32>
    %15 = arith.maximumf %13, %14 : vector<16x32xf32>
    %c0_14 = arith.constant 0 : index
    %c0_15 = arith.constant 0 : index
    %16 = vector.load %arg2[%c0_14, %c0_15] : memref<2x32xf32, #tpu.memory_space<vmem>>, vector<2x32xf32>
    %c0_16 = arith.constant 0 : index
    %c0_17 = arith.constant 0 : index
    %17 = vector.load %arg9[%c0_16, %c0_17] : memref<32x32xf32, #tpu.memory_space<vmem>>, vector<32x32xf32>
    %cst_18 = arith.constant dense<0.000000e+00> : vector<2x32xf32>
    %18 = tpu.matmul %16, %17, %cst_18 {dimension_numbers = #tpu.dot_dimension_numbers<[1], [0], [0], [1], [0, 0, 1, 1], [], []>} : vector<2x32xf32>, vector<32x32xf32>, vector<2x32xf32> -> vector<2x32xf32>
    %c0_19 = arith.constant 0 : index
    %c0_20 = arith.constant 0 : index
    %19 = vector.load %arg10[%c0_19, %c0_20] : memref<1x32xf32, #tpu.memory_space<vmem>>, vector<1x32xf32>
    %20 = vector.broadcast %19 : vector<1x32xf32> to vector<2x32xf32>
    %21 = arith.addf %18, %20 : vector<2x32xf32>
    %cst_21 = arith.constant 0.000000e+00 : f32
    %22 = vector.broadcast %cst_21 : f32 to vector<2x32xf32>
    %23 = arith.maximumf %21, %22 : vector<2x32xf32>
    %c0_22 = arith.constant 0 : index
    %c0_23 = arith.constant 0 : index
    %24 = vector.load %arg4[%c0_22, %c0_23] : memref<2x3xf32, #tpu.memory_space<vmem>>, vector<2x3xf32>
    %c0_24 = arith.constant 0 : index
    %c0_25 = arith.constant 0 : index
    %25 = vector.load %arg13[%c0_24, %c0_25] : memref<3x32xf32, #tpu.memory_space<vmem>>, vector<3x32xf32>
    %cst_26 = arith.constant dense<0.000000e+00> : vector<2x32xf32>
    %26 = tpu.matmul %24, %25, %cst_26 {dimension_numbers = #tpu.dot_dimension_numbers<[1], [0], [0], [1], [0, 0, 1, 1], [], []>} : vector<2x3xf32>, vector<3x32xf32>, vector<2x32xf32> -> vector<2x32xf32>
    %c0_27 = arith.constant 0 : index
    %c0_28 = arith.constant 0 : index
    %27 = vector.load %arg14[%c0_27, %c0_28] : memref<1x32xf32, #tpu.memory_space<vmem>>, vector<1x32xf32>
    %28 = vector.broadcast %27 : vector<1x32xf32> to vector<2x32xf32>
    %29 = arith.addf %26, %28 : vector<2x32xf32>
    %cst_29 = arith.constant 0.000000e+00 : f32
    %30 = vector.broadcast %cst_29 : f32 to vector<2x32xf32>
    %31 = arith.maximumf %29, %30 : vector<2x32xf32>
    %c0_30 = arith.constant 0 : index
    %c0_31 = arith.constant 0 : index
    %32 = vector.load %arg6[%c0_30, %c0_31] : memref<2x16xf32, #tpu.memory_space<vmem>>, vector<2x16xf32>
    %cst_32 = arith.constant dense<0.000000e+00> : vector<2x32xf32>
    %33 = tpu.matmul %32, %7, %cst_32 {dimension_numbers = #tpu.dot_dimension_numbers<[1], [0], [0], [1], [0, 0, 1, 1], [], []>} : vector<2x16xf32>, vector<16x32xf32>, vector<2x32xf32> -> vector<2x32xf32>
    %c0_33 = arith.constant 0 : index
    %c0_34 = arith.constant 0 : index
    %34 = vector.load %arg5[%c0_33, %c0_34] : memref<2x2xf32, #tpu.memory_space<vmem>>, vector<2x2xf32>
    %35 = tpu.concatenate %33, %34 in 1 : vector<2x32xf32>, vector<2x2xf32> -> vector<2x34xf32>
    %c0_35 = arith.constant 0 : index
    %c0_36 = arith.constant 0 : index
    %36 = vector.load %arg15[%c0_35, %c0_36] : memref<34x32xf32, #tpu.memory_space<vmem>>, vector<34x32xf32>
    %cst_37 = arith.constant dense<0.000000e+00> : vector<2x32xf32>
    %37 = tpu.matmul %35, %36, %cst_37 {dimension_numbers = #tpu.dot_dimension_numbers<[1], [0], [0], [1], [0, 0, 1, 1], [], []>} : vector<2x34xf32>, vector<34x32xf32>, vector<2x32xf32> -> vector<2x32xf32>
    %c0_38 = arith.constant 0 : index
    %c0_39 = arith.constant 0 : index
    %38 = vector.load %arg16[%c0_38, %c0_39] : memref<1x32xf32, #tpu.memory_space<vmem>>, vector<1x32xf32>
    %39 = vector.broadcast %38 : vector<1x32xf32> to vector<2x32xf32>
    %40 = arith.addf %37, %39 : vector<2x32xf32>
    %cst_40 = arith.constant 0.000000e+00 : f32
    %41 = vector.broadcast %cst_40 : f32 to vector<2x32xf32>
    %42 = arith.maximumf %40, %41 : vector<2x32xf32>
    %c0_41 = arith.constant 0 : index
    %c0_42 = arith.constant 0 : index
    %43 = vector.load %arg17[%c0_41, %c0_42] : memref<32x4xf32, #tpu.memory_space<vmem>>, vector<32x4xf32>
    %cst_43 = arith.constant dense<0.000000e+00> : vector<2x4xf32>
    %44 = tpu.matmul %42, %43, %cst_43 {dimension_numbers = #tpu.dot_dimension_numbers<[1], [0], [0], [1], [0, 0, 1, 1], [], []>} : vector<2x32xf32>, vector<32x4xf32>, vector<2x4xf32> -> vector<2x4xf32>
    %c0_44 = arith.constant 0 : index
    %c0_45 = arith.constant 0 : index
    %45 = vector.load %arg18[%c0_44, %c0_45] : memref<1x4xf32, #tpu.memory_space<vmem>>, vector<1x4xf32>
    %46 = vector.broadcast %45 : vector<1x4xf32> to vector<2x4xf32>
    %47 = arith.addf %44, %46 : vector<2x4xf32>
    %cst_46 = arith.constant dense<0xFF800000> : vector<2xf32>
    %48 = vector.multi_reduction <maximumf>, %47, %cst_46 [1] : vector<2x4xf32> to vector<2xf32>
    %49 = vector.shape_cast %48 : vector<2xf32> to vector<2x1xf32>
    %50 = vector.broadcast %49 : vector<2x1xf32> to vector<2x4xf32>
    %51 = arith.subf %47, %50 : vector<2x4xf32>
    %52 = math.exp %51 : vector<2x4xf32>
    %cst_47 = arith.constant dense<0.000000e+00> : vector<2xf32>
    %53 = vector.multi_reduction <add>, %52, %cst_47 [1] : vector<2x4xf32> to vector<2xf32>
    %54 = vector.shape_cast %53 : vector<2xf32> to vector<2x1xf32>
    %55 = tpu.reciprocal %54 {approx = true} : vector<2x1xf32> -> vector<2x1xf32>
    %56 = vector.broadcast %55 : vector<2x1xf32> to vector<2x4xf32>
    %57 = arith.mulf %52, %56 : vector<2x4xf32>
    %c0_48 = arith.constant 0 : index
    %c0_49 = arith.constant 0 : index
    %58 = vector.load %arg29[%c0_48, %c0_49] : memref<2x4xf32, #tpu.memory_space<vmem>>, vector<2x4xf32>
    tpu.vector_store %arg29[%c0_48, %c0_49], %57 {strides = array<i32>} : memref<2x4xf32, #tpu.memory_space<vmem>>, vector<2x4xf32>,
    %59 = tpu.concatenate %57, %57, %57, %57, %57, %57, %57, %57 in 0 : vector<2x4xf32>, vector<2x4xf32>, vector<2x4xf32>, vector<2x4xf32>, vector<2x4xf32>, vector<2x4xf32>, vector<2x4xf32>, vector<2x4xf32> -> vector<16x4xf32>
    %60 = vector.extract_strided_slice %57 {offsets = [0, 1], sizes = [2, 1], strides = [1, 1]} : vector<2x4xf32> to vector<2x1xf32>
    %61 = vector.broadcast %60 : vector<2x1xf32> to vector<2x32xf32>
    %62 = arith.mulf %61, %23 : vector<2x32xf32>
    %63 = vector.extract_strided_slice %57 {offsets = [0, 3], sizes = [2, 1], strides = [1, 1]} : vector<2x4xf32> to vector<2x1xf32>
    %64 = vector.broadcast %63 : vector<2x1xf32> to vector<2x32xf32>
    %65 = arith.mulf %64, %31 : vector<2x32xf32>
    %66 = arith.addf %62, %65 : vector<2x32xf32>
    %67 = vector.extract_strided_slice %59 {offsets = [0, 0], sizes = [16, 1], strides = [1, 1]} : vector<16x4xf32> to vector<16x1xf32>
    %68 = vector.broadcast %67 : vector<16x1xf32> to vector<16x32xf32>
    %69 = arith.mulf %68, %7 : vector<16x32xf32>
    %70 = vector.extract_strided_slice %59 {offsets = [0, 2], sizes = [16, 1], strides = [1, 1]} : vector<16x4xf32> to vector<16x1xf32>
    %71 = vector.broadcast %70 : vector<16x1xf32> to vector<16x32xf32>
    %72 = arith.mulf %71, %15 : vector<16x32xf32>
    %73 = arith.addf %69, %72 : vector<16x32xf32>
    %74 = tpu.concatenate %66, %66, %66, %66, %66, %66, %66, %66 in 0 : vector<2x32xf32>, vector<2x32xf32>, vector<2x32xf32>, vector<2x32xf32>, vector<2x32xf32>, vector<2x32xf32>, vector<2x32xf32>, vector<2x32xf32> -> vector<16x32xf32>
    %75 = arith.addf %73, %74 : vector<16x32xf32>
    %c0_50 = arith.constant 0 : index
    %c0_51 = arith.constant 0 : index
    %76 = vector.load %arg19[%c0_50, %c0_51] : memref<32x64xf32, #tpu.memory_space<vmem>>, vector<32x64xf32>
    %cst_52 = arith.constant dense<0.000000e+00> : vector<16x64xf32>
    %77 = tpu.matmul %75, %76, %cst_52 {dimension_numbers = #tpu.dot_dimension_numbers<[1], [0], [0], [1], [0, 0, 1, 1], [], []>} : vector<16x32xf32>, vector<32x64xf32>, vector<16x64xf32> -> vector<16x64xf32>
    %c0_53 = arith.constant 0 : index
    %c0_54 = arith.constant 0 : index
    %78 = vector.load %arg21[%c0_53, %c0_54] : memref<1x64xf32, #tpu.memory_space<vmem>>, vector<1x64xf32>
    %79 = vector.broadcast %78 : vector<1x64xf32> to vector<16x64xf32>
    %80 = arith.addf %77, %79 : vector<16x64xf32>
    %c0_55 = arith.constant 0 : index
    %c0_56 = arith.constant 0 : index
    %81 = vector.load %arg22[%c0_55, %c0_56] : memref<32x64xf32, #tpu.memory_space<vmem>>, vector<32x64xf32>
    %cst_57 = arith.constant dense<0.000000e+00> : vector<16x64xf32>
    %82 = tpu.matmul %75, %81, %cst_57 {dimension_numbers = #tpu.dot_dimension_numbers<[1], [0], [0], [1], [0, 0, 1, 1], [], []>} : vector<16x32xf32>, vector<32x64xf32>, vector<16x64xf32> -> vector<16x64xf32>
    %c0_58 = arith.constant 0 : index
    %c0_59 = arith.constant 0 : index
    %83 = vector.load %arg24[%c0_58, %c0_59] : memref<1x64xf32, #tpu.memory_space<vmem>>, vector<1x64xf32>
    %84 = vector.broadcast %83 : vector<1x64xf32> to vector<16x64xf32>
    %85 = arith.addf %82, %84 : vector<16x64xf32>
    %c0_60 = arith.constant 0 : index
    %c0_61 = arith.constant 0 : index
    %86 = vector.load %arg20[%c0_60, %c0_61] : memref<16x64xf32, #tpu.memory_space<vmem>>, vector<16x64xf32>
    %c0_62 = arith.constant 0 : index
    %c0_63 = arith.constant 0 : index
    %87 = vector.load %arg23[%c0_62, %c0_63] : memref<16x64xf32, #tpu.memory_space<vmem>>, vector<16x64xf32>
    %cst_64 = arith.constant 0.000000e+00 : f32
    %88 = vector.broadcast %cst_64 : f32 to vector<2x16xf32>
    %89 = vector.extract_strided_slice %80 {offsets = [0, 0], sizes = [2, 64], strides = [1, 1]} : vector<16x64xf32> to vector<2x64xf32>
    %cst_65 = arith.constant dense<0.000000e+00> : vector<2x64xf32>
    %90 = tpu.matmul %88, %86, %cst_65 {dimension_numbers = #tpu.dot_dimension_numbers<[1], [0], [0], [1], [0, 0, 1, 1], [], []>} : vector<2x16xf32>, vector<16x64xf32>, vector<2x64xf32> -> vector<2x64xf32>
    %91 = arith.addf %89, %90 : vector<2x64xf32>
    %92 = vector.extract_strided_slice %91 {offsets = [0, 0], sizes = [2, 16], strides = [1, 1]} : vector<2x64xf32> to vector<2x16xf32>
    %93 = arith.negf %92 : vector<2x16xf32>
    %94 = math.exp %93 : vector<2x16xf32>
    %cst_66 = arith.constant 1.000000e+00 : f32
    %95 = vector.broadcast %cst_66 : f32 to vector<2x16xf32>
    %96 = arith.addf %95, %94 : vector<2x16xf32>
    %97 = arith.divf %95, %96 : vector<2x16xf32>
    %98 = vector.extract_strided_slice %91 {offsets = [0, 16], sizes = [2, 16], strides = [1, 1]} : vector<2x64xf32> to vector<2x16xf32>
    %99 = arith.negf %98 : vector<2x16xf32>
    %100 = math.exp %99 : vector<2x16xf32>
    %cst_67 = arith.constant 1.000000e+00 : f32
    %101 = vector.broadcast %cst_67 : f32 to vector<2x16xf32>
    %102 = arith.addf %101, %100 : vector<2x16xf32>
    %103 = arith.divf %101, %102 : vector<2x16xf32>
    %104 = vector.extract_strided_slice %91 {offsets = [0, 32], sizes = [2, 16], strides = [1, 1]} : vector<2x64xf32> to vector<2x16xf32>
    %105 = math.tanh %104 : vector<2x16xf32>
    %106 = vector.extract_strided_slice %91 {offsets = [0, 48], sizes = [2, 16], strides = [1, 1]} : vector<2x64xf32> to vector<2x16xf32>
    %107 = arith.negf %106 : vector<2x16xf32>
    %108 = math.exp %107 : vector<2x16xf32>
    %cst_68 = arith.constant 1.000000e+00 : f32
    %109 = vector.broadcast %cst_68 : f32 to vector<2x16xf32>
    %110 = arith.addf %109, %108 : vector<2x16xf32>
    %111 = arith.divf %109, %110 : vector<2x16xf32>
    %112 = arith.mulf %103, %88 : vector<2x16xf32>
    %113 = arith.mulf %97, %105 : vector<2x16xf32>
    %114 = arith.addf %112, %113 : vector<2x16xf32>
    %115 = math.tanh %114 : vector<2x16xf32>
    %116 = arith.mulf %111, %115 : vector<2x16xf32>
    %117 = vector.extract_strided_slice %85 {offsets = [14, 0], sizes = [2, 64], strides = [1, 1]} : vector<16x64xf32> to vector<2x64xf32>
    %cst_69 = arith.constant dense<0.000000e+00> : vector<2x64xf32>
    %118 = tpu.matmul %88, %87, %cst_69 {dimension_numbers = #tpu.dot_dimension_numbers<[1], [0], [0], [1], [0, 0, 1, 1], [], []>} : vector<2x16xf32>, vector<16x64xf32>, vector<2x64xf32> -> vector<2x64xf32>
    %119 = arith.addf %117, %118 : vector<2x64xf32>
    %120 = vector.extract_strided_slice %119 {offsets = [0, 0], sizes = [2, 16], strides = [1, 1]} : vector<2x64xf32> to vector<2x16xf32>
    %121 = arith.negf %120 : vector<2x16xf32>
    %122 = math.exp %121 : vector<2x16xf32>
    %cst_70 = arith.constant 1.000000e+00 : f32
    %123 = vector.broadcast %cst_70 : f32 to vector<2x16xf32>
    %124 = arith.addf %123, %122 : vector<2x16xf32>
    %125 = arith.divf %123, %124 : vector<2x16xf32>
    %126 = vector.extract_strided_slice %119 {offsets = [0, 16], sizes = [2, 16], strides = [1, 1]} : vector<2x64xf32> to vector<2x16xf32>
    %127 = arith.negf %126 : vector<2x16xf32>
    %128 = math.exp %127 : vector<2x16xf32>
    %cst_71 = arith.constant 1.000000e+00 : f32
    %129 = vector.broadcast %cst_71 : f32 to vector<2x16xf32>
    %130 = arith.addf %129, %128 : vector<2x16xf32>
    %131 = arith.divf %129, %130 : vector<2x16xf32>
    %132 = vector.extract_strided_slice %119 {offsets = [0, 32], sizes = [2, 16], strides = [1, 1]} : vector<2x64xf32> to vector<2x16xf32>
    %133 = math.tanh %132 : vector<2x16xf32>
    %134 = vector.extract_strided_slice %119 {offsets = [0, 48], sizes = [2, 16], strides = [1, 1]} : vector<2x64xf32> to vector<2x16xf32>
    %135 = arith.negf %134 : vector<2x16xf32>
    %136 = math.exp %135 : vector<2x16xf32>
    %cst_72 = arith.constant 1.000000e+00 : f32
    %137 = vector.broadcast %cst_72 : f32 to vector<2x16xf32>
    %138 = arith.addf %137, %136 : vector<2x16xf32>
    %139 = arith.divf %137, %138 : vector<2x16xf32>
    %140 = arith.mulf %131, %88 : vector<2x16xf32>
    %141 = arith.mulf %125, %133 : vector<2x16xf32>
    %142 = arith.addf %140, %141 : vector<2x16xf32>
    %143 = math.tanh %142 : vector<2x16xf32>
    %144 = arith.mulf %139, %143 : vector<2x16xf32>
    %145 = vector.extract_strided_slice %80 {offsets = [2, 0], sizes = [2, 64], strides = [1, 1]} : vector<16x64xf32> to vector<2x64xf32>
    %cst_73 = arith.constant dense<0.000000e+00> : vector<2x64xf32>
    %146 = tpu.matmul %116, %86, %cst_73 {dimension_numbers = #tpu.dot_dimension_numbers<[1], [0], [0], [1], [0, 0, 1, 1], [], []>} : vector<2x16xf32>, vector<16x64xf32>, vector<2x64xf32> -> vector<2x64xf32>
    %147 = arith.addf %145, %146 : vector<2x64xf32>
    %148 = vector.extract_strided_slice %147 {offsets = [0, 0], sizes = [2, 16], strides = [1, 1]} : vector<2x64xf32> to vector<2x16xf32>
    %149 = arith.negf %148 : vector<2x16xf32>
    %150 = math.exp %149 : vector<2x16xf32>
    %cst_74 = arith.constant 1.000000e+00 : f32
    %151 = vector.broadcast %cst_74 : f32 to vector<2x16xf32>
    %152 = arith.addf %151, %150 : vector<2x16xf32>
    %153 = arith.divf %151, %152 : vector<2x16xf32>
    %154 = vector.extract_strided_slice %147 {offsets = [0, 16], sizes = [2, 16], strides = [1, 1]} : vector<2x64xf32> to vector<2x16xf32>
    %155 = arith.negf %154 : vector<2x16xf32>
    %156 = math.exp %155 : vector<2x16xf32>
    %cst_75 = arith.constant 1.000000e+00 : f32
    %157 = vector.broadcast %cst_75 : f32 to vector<2x16xf32>
    %158 = arith.addf %157, %156 : vector<2x16xf32>
    %159 = arith.divf %157, %158 : vector<2x16xf32>
    %160 = vector.extract_strided_slice %147 {offsets = [0, 32], sizes = [2, 16], strides = [1, 1]} : vector<2x64xf32> to vector<2x16xf32>
    %161 = math.tanh %160 : vector<2x16xf32>
    %162 = vector.extract_strided_slice %147 {offsets = [0, 48], sizes = [2, 16], strides = [1, 1]} : vector<2x64xf32> to vector<2x16xf32>
    %163 = arith.negf %162 : vector<2x16xf32>
    %164 = math.exp %163 : vector<2x16xf32>
    %cst_76 = arith.constant 1.000000e+00 : f32
    %165 = vector.broadcast %cst_76 : f32 to vector<2x16xf32>
    %166 = arith.addf %165, %164 : vector<2x16xf32>
    %167 = arith.divf %165, %166 : vector<2x16xf32>
    %168 = arith.mulf %159, %114 : vector<2x16xf32>
    %169 = arith.mulf %153, %161 : vector<2x16xf32>
    %170 = arith.addf %168, %169 : vector<2x16xf32>
    %171 = math.tanh %170 : vector<2x16xf32>
    %172 = arith.mulf %167, %171 : vector<2x16xf32>
    %173 = vector.extract_strided_slice %85 {offsets = [12, 0], sizes = [2, 64], strides = [1, 1]} : vector<16x64xf32> to vector<2x64xf32>
    %cst_77 = arith.constant dense<0.000000e+00> : vector<2x64xf32>
    %174 = tpu.matmul %144, %87, %cst_77 {dimension_numbers = #tpu.dot_dimension_numbers<[1], [0], [0], [1], [0, 0, 1, 1], [], []>} : vector<2x16xf32>, vector<16x64xf32>, vector<2x64xf32> -> vector<2x64xf32>
    %175 = arith.addf %173, %174 : vector<2x64xf32>
    %176 = vector.extract_strided_slice %175 {offsets = [0, 0], sizes = [2, 16], strides = [1, 1]} : vector<2x64xf32> to vector<2x16xf32>
    %177 = arith.negf %176 : vector<2x16xf32>
    %178 = math.exp %177 : vector<2x16xf32>
    %cst_78 = arith.constant 1.000000e+00 : f32
    %179 = vector.broadcast %cst_78 : f32 to vector<2x16xf32>
    %180 = arith.addf %179, %178 : vector<2x16xf32>
    %181 = arith.divf %179, %180 : vector<2x16xf32>
    %182 = vector.extract_strided_slice %175 {offsets = [0, 16], sizes = [2, 16], strides = [1, 1]} : vector<2x64xf32> to vector<2x16xf32>
    %183 = arith.negf %182 : vector<2x16xf32>
    %184 = math.exp %183 : vector<2x16xf32>
    %cst_79 = arith.constant 1.000000e+00 : f32
    %185 = vector.broadcast %cst_79 : f32 to vector<2x16xf32>
    %186 = arith.addf %185, %184 : vector<2x16xf32>
    %187 = arith.divf %185, %186 : vector<2x16xf32>
    %188 = vector.extract_strided_slice %175 {offsets = [0, 32], sizes = [2, 16], strides = [1, 1]} : vector<2x64xf32> to vector<2x16xf32>
    %189 = math.tanh %188 : vector<2x16xf32>
    %190 = vector.extract_strided_slice %175 {offsets = [0, 48], sizes = [2, 16], strides = [1, 1]} : vector<2x64xf32> to vector<2x16xf32>
    %191 = arith.negf %190 : vector<2x16xf32>
    %192 = math.exp %191 : vector<2x16xf32>
    %cst_80 = arith.constant 1.000000e+00 : f32
    %193 = vector.broadcast %cst_80 : f32 to vector<2x16xf32>
    %194 = arith.addf %193, %192 : vector<2x16xf32>
    %195 = arith.divf %193, %194 : vector<2x16xf32>
    %196 = arith.mulf %187, %142 : vector<2x16xf32>
    %197 = arith.mulf %181, %189 : vector<2x16xf32>
    %198 = arith.addf %196, %197 : vector<2x16xf32>
    %199 = math.tanh %198 : vector<2x16xf32>
    %200 = arith.mulf %195, %199 : vector<2x16xf32>
    %201 = vector.extract_strided_slice %80 {offsets = [4, 0], sizes = [2, 64], strides = [1, 1]} : vector<16x64xf32> to vector<2x64xf32>
    %cst_81 = arith.constant dense<0.000000e+00> : vector<2x64xf32>
    %202 = tpu.matmul %172, %86, %cst_81 {dimension_numbers = #tpu.dot_dimension_numbers<[1], [0], [0], [1], [0, 0, 1, 1], [], []>} : vector<2x16xf32>, vector<16x64xf32>, vector<2x64xf32> -> vector<2x64xf32>
    %203 = arith.addf %201, %202 : vector<2x64xf32>
    %204 = vector.extract_strided_slice %203 {offsets = [0, 0], sizes = [2, 16], strides = [1, 1]} : vector<2x64xf32> to vector<2x16xf32>
    %205 = arith.negf %204 : vector<2x16xf32>
    %206 = math.exp %205 : vector<2x16xf32>
    %cst_82 = arith.constant 1.000000e+00 : f32
    %207 = vector.broadcast %cst_82 : f32 to vector<2x16xf32>
    %208 = arith.addf %207, %206 : vector<2x16xf32>
    %209 = arith.divf %207, %208 : vector<2x16xf32>
    %210 = vector.extract_strided_slice %203 {offsets = [0, 16], sizes = [2, 16], strides = [1, 1]} : vector<2x64xf32> to vector<2x16xf32>
    %211 = arith.negf %210 : vector<2x16xf32>
    %212 = math.exp %211 : vector<2x16xf32>
    %cst_83 = arith.constant 1.000000e+00 : f32
    %213 = vector.broadcast %cst_83 : f32 to vector<2x16xf32>
    %214 = arith.addf %213, %212 : vector<2x16xf32>
    %215 = arith.divf %213, %214 : vector<2x16xf32>
    %216 = vector.extract_strided_slice %203 {offsets = [0, 32], sizes = [2, 16], strides = [1, 1]} : vector<2x64xf32> to vector<2x16xf32>
    %217 = math.tanh %216 : vector<2x16xf32>
    %218 = vector.extract_strided_slice %203 {offsets = [0, 48], sizes = [2, 16], strides = [1, 1]} : vector<2x64xf32> to vector<2x16xf32>
    %219 = arith.negf %218 : vector<2x16xf32>
    %220 = math.exp %219 : vector<2x16xf32>
    %cst_84 = arith.constant 1.000000e+00 : f32
    %221 = vector.broadcast %cst_84 : f32 to vector<2x16xf32>
    %222 = arith.addf %221, %220 : vector<2x16xf32>
    %223 = arith.divf %221, %222 : vector<2x16xf32>
    %224 = arith.mulf %215, %170 : vector<2x16xf32>
    %225 = arith.mulf %209, %217 : vector<2x16xf32>
    %226 = arith.addf %224, %225 : vector<2x16xf32>
    %227 = math.tanh %226 : vector<2x16xf32>
    %228 = arith.mulf %223, %227 : vector<2x16xf32>
    %229 = vector.extract_strided_slice %85 {offsets = [10, 0], sizes = [2, 64], strides = [1, 1]} : vector<16x64xf32> to vector<2x64xf32>
    %cst_85 = arith.constant dense<0.000000e+00> : vector<2x64xf32>
    %230 = tpu.matmul %200, %87, %cst_85 {dimension_numbers = #tpu.dot_dimension_numbers<[1], [0], [0], [1], [0, 0, 1, 1], [], []>} : vector<2x16xf32>, vector<16x64xf32>, vector<2x64xf32> -> vector<2x64xf32>
    %231 = arith.addf %229, %230 : vector<2x64xf32>
    %232 = vector.extract_strided_slice %231 {offsets = [0, 0], sizes = [2, 16], strides = [1, 1]} : vector<2x64xf32> to vector<2x16xf32>
    %233 = arith.negf %232 : vector<2x16xf32>
    %234 = math.exp %233 : vector<2x16xf32>
    %cst_86 = arith.constant 1.000000e+00 : f32
    %235 = vector.broadcast %cst_86 : f32 to vector<2x16xf32>
    %236 = arith.addf %235, %234 : vector<2x16xf32>
    %237 = arith.divf %235, %236 : vector<2x16xf32>
    %238 = vector.extract_strided_slice %231 {offsets = [0, 16], sizes = [2, 16], strides = [1, 1]} : vector<2x64xf32> to vector<2x16xf32>
    %239 = arith.negf %238 : vector<2x16xf32>
    %240 = math.exp %239 : vector<2x16xf32>
    %cst_87 = arith.constant 1.000000e+00 : f32
    %241 = vector.broadcast %cst_87 : f32 to vector<2x16xf32>
    %242 = arith.addf %241, %240 : vector<2x16xf32>
    %243 = arith.divf %241, %242 : vector<2x16xf32>
    %244 = vector.extract_strided_slice %231 {offsets = [0, 32], sizes = [2, 16], strides = [1, 1]} : vector<2x64xf32> to vector<2x16xf32>
    %245 = math.tanh %244 : vector<2x16xf32>
    %246 = vector.extract_strided_slice %231 {offsets = [0, 48], sizes = [2, 16], strides = [1, 1]} : vector<2x64xf32> to vector<2x16xf32>
    %247 = arith.negf %246 : vector<2x16xf32>
    %248 = math.exp %247 : vector<2x16xf32>
    %cst_88 = arith.constant 1.000000e+00 : f32
    %249 = vector.broadcast %cst_88 : f32 to vector<2x16xf32>
    %250 = arith.addf %249, %248 : vector<2x16xf32>
    %251 = arith.divf %249, %250 : vector<2x16xf32>
    %252 = arith.mulf %243, %198 : vector<2x16xf32>
    %253 = arith.mulf %237, %245 : vector<2x16xf32>
    %254 = arith.addf %252, %253 : vector<2x16xf32>
    %255 = math.tanh %254 : vector<2x16xf32>
    %256 = arith.mulf %251, %255 : vector<2x16xf32>
    %257 = vector.extract_strided_slice %80 {offsets = [6, 0], sizes = [2, 64], strides = [1, 1]} : vector<16x64xf32> to vector<2x64xf32>
    %cst_89 = arith.constant dense<0.000000e+00> : vector<2x64xf32>
    %258 = tpu.matmul %228, %86, %cst_89 {dimension_numbers = #tpu.dot_dimension_numbers<[1], [0], [0], [1], [0, 0, 1, 1], [], []>} : vector<2x16xf32>, vector<16x64xf32>, vector<2x64xf32> -> vector<2x64xf32>
    %259 = arith.addf %257, %258 : vector<2x64xf32>
    %260 = vector.extract_strided_slice %259 {offsets = [0, 0], sizes = [2, 16], strides = [1, 1]} : vector<2x64xf32> to vector<2x16xf32>
    %261 = arith.negf %260 : vector<2x16xf32>
    %262 = math.exp %261 : vector<2x16xf32>
    %cst_90 = arith.constant 1.000000e+00 : f32
    %263 = vector.broadcast %cst_90 : f32 to vector<2x16xf32>
    %264 = arith.addf %263, %262 : vector<2x16xf32>
    %265 = arith.divf %263, %264 : vector<2x16xf32>
    %266 = vector.extract_strided_slice %259 {offsets = [0, 16], sizes = [2, 16], strides = [1, 1]} : vector<2x64xf32> to vector<2x16xf32>
    %267 = arith.negf %266 : vector<2x16xf32>
    %268 = math.exp %267 : vector<2x16xf32>
    %cst_91 = arith.constant 1.000000e+00 : f32
    %269 = vector.broadcast %cst_91 : f32 to vector<2x16xf32>
    %270 = arith.addf %269, %268 : vector<2x16xf32>
    %271 = arith.divf %269, %270 : vector<2x16xf32>
    %272 = vector.extract_strided_slice %259 {offsets = [0, 32], sizes = [2, 16], strides = [1, 1]} : vector<2x64xf32> to vector<2x16xf32>
    %273 = math.tanh %272 : vector<2x16xf32>
    %274 = vector.extract_strided_slice %259 {offsets = [0, 48], sizes = [2, 16], strides = [1, 1]} : vector<2x64xf32> to vector<2x16xf32>
    %275 = arith.negf %274 : vector<2x16xf32>
    %276 = math.exp %275 : vector<2x16xf32>
    %cst_92 = arith.constant 1.000000e+00 : f32
    %277 = vector.broadcast %cst_92 : f32 to vector<2x16xf32>
    %278 = arith.addf %277, %276 : vector<2x16xf32>
    %279 = arith.divf %277, %278 : vector<2x16xf32>
    %280 = arith.mulf %271, %226 : vector<2x16xf32>
    %281 = arith.mulf %265, %273 : vector<2x16xf32>
    %282 = arith.addf %280, %281 : vector<2x16xf32>
    %283 = math.tanh %282 : vector<2x16xf32>
    %284 = arith.mulf %279, %283 : vector<2x16xf32>
    %285 = vector.extract_strided_slice %85 {offsets = [8, 0], sizes = [2, 64], strides = [1, 1]} : vector<16x64xf32> to vector<2x64xf32>
    %cst_93 = arith.constant dense<0.000000e+00> : vector<2x64xf32>
    %286 = tpu.matmul %256, %87, %cst_93 {dimension_numbers = #tpu.dot_dimension_numbers<[1], [0], [0], [1], [0, 0, 1, 1], [], []>} : vector<2x16xf32>, vector<16x64xf32>, vector<2x64xf32> -> vector<2x64xf32>
    %287 = arith.addf %285, %286 : vector<2x64xf32>
    %288 = vector.extract_strided_slice %287 {offsets = [0, 0], sizes = [2, 16], strides = [1, 1]} : vector<2x64xf32> to vector<2x16xf32>
    %289 = arith.negf %288 : vector<2x16xf32>
    %290 = math.exp %289 : vector<2x16xf32>
    %cst_94 = arith.constant 1.000000e+00 : f32
    %291 = vector.broadcast %cst_94 : f32 to vector<2x16xf32>
    %292 = arith.addf %291, %290 : vector<2x16xf32>
    %293 = arith.divf %291, %292 : vector<2x16xf32>
    %294 = vector.extract_strided_slice %287 {offsets = [0, 16], sizes = [2, 16], strides = [1, 1]} : vector<2x64xf32> to vector<2x16xf32>
    %295 = arith.negf %294 : vector<2x16xf32>
    %296 = math.exp %295 : vector<2x16xf32>
    %cst_95 = arith.constant 1.000000e+00 : f32
    %297 = vector.broadcast %cst_95 : f32 to vector<2x16xf32>
    %298 = arith.addf %297, %296 : vector<2x16xf32>
    %299 = arith.divf %297, %298 : vector<2x16xf32>
    %300 = vector.extract_strided_slice %287 {offsets = [0, 32], sizes = [2, 16], strides = [1, 1]} : vector<2x64xf32> to vector<2x16xf32>
    %301 = math.tanh %300 : vector<2x16xf32>
    %302 = vector.extract_strided_slice %287 {offsets = [0, 48], sizes = [2, 16], strides = [1, 1]} : vector<2x64xf32> to vector<2x16xf32>
    %303 = arith.negf %302 : vector<2x16xf32>
    %304 = math.exp %303 : vector<2x16xf32>
    %cst_96 = arith.constant 1.000000e+00 : f32
    %305 = vector.broadcast %cst_96 : f32 to vector<2x16xf32>
    %306 = arith.addf %305, %304 : vector<2x16xf32>
    %307 = arith.divf %305, %306 : vector<2x16xf32>
    %308 = arith.mulf %299, %254 : vector<2x16xf32>
    %309 = arith.mulf %293, %301 : vector<2x16xf32>
    %310 = arith.addf %308, %309 : vector<2x16xf32>
    %311 = math.tanh %310 : vector<2x16xf32>
    %312 = arith.mulf %307, %311 : vector<2x16xf32>
    %313 = vector.extract_strided_slice %80 {offsets = [8, 0], sizes = [2, 64], strides = [1, 1]} : vector<16x64xf32> to vector<2x64xf32>
    %cst_97 = arith.constant dense<0.000000e+00> : vector<2x64xf32>
    %314 = tpu.matmul %284, %86, %cst_97 {dimension_numbers = #tpu.dot_dimension_numbers<[1], [0], [0], [1], [0, 0, 1, 1], [], []>} : vector<2x16xf32>, vector<16x64xf32>, vector<2x64xf32> -> vector<2x64xf32>
    %315 = arith.addf %313, %314 : vector<2x64xf32>
    %316 = vector.extract_strided_slice %315 {offsets = [0, 0], sizes = [2, 16], strides = [1, 1]} : vector<2x64xf32> to vector<2x16xf32>
    %317 = arith.negf %316 : vector<2x16xf32>
    %318 = math.exp %317 : vector<2x16xf32>
    %cst_98 = arith.constant 1.000000e+00 : f32
    %319 = vector.broadcast %cst_98 : f32 to vector<2x16xf32>
    %320 = arith.addf %319, %318 : vector<2x16xf32>
    %321 = arith.divf %319, %320 : vector<2x16xf32>
    %322 = vector.extract_strided_slice %315 {offsets = [0, 16], sizes = [2, 16], strides = [1, 1]} : vector<2x64xf32> to vector<2x16xf32>
    %323 = arith.negf %322 : vector<2x16xf32>
    %324 = math.exp %323 : vector<2x16xf32>
    %cst_99 = arith.constant 1.000000e+00 : f32
    %325 = vector.broadcast %cst_99 : f32 to vector<2x16xf32>
    %326 = arith.addf %325, %324 : vector<2x16xf32>
    %327 = arith.divf %325, %326 : vector<2x16xf32>
    %328 = vector.extract_strided_slice %315 {offsets = [0, 32], sizes = [2, 16], strides = [1, 1]} : vector<2x64xf32> to vector<2x16xf32>
    %329 = math.tanh %328 : vector<2x16xf32>
    %330 = vector.extract_strided_slice %315 {offsets = [0, 48], sizes = [2, 16], strides = [1, 1]} : vector<2x64xf32> to vector<2x16xf32>
    %331 = arith.negf %330 : vector<2x16xf32>
    %332 = math.exp %331 : vector<2x16xf32>
    %cst_100 = arith.constant 1.000000e+00 : f32
    %333 = vector.broadcast %cst_100 : f32 to vector<2x16xf32>
    %334 = arith.addf %333, %332 : vector<2x16xf32>
    %335 = arith.divf %333, %334 : vector<2x16xf32>
    %336 = arith.mulf %327, %282 : vector<2x16xf32>
    %337 = arith.mulf %321, %329 : vector<2x16xf32>
    %338 = arith.addf %336, %337 : vector<2x16xf32>
    %339 = math.tanh %338 : vector<2x16xf32>
    %340 = arith.mulf %335, %339 : vector<2x16xf32>
    %341 = vector.extract_strided_slice %85 {offsets = [6, 0], sizes = [2, 64], strides = [1, 1]} : vector<16x64xf32> to vector<2x64xf32>
    %cst_101 = arith.constant dense<0.000000e+00> : vector<2x64xf32>
    %342 = tpu.matmul %312, %87, %cst_101 {dimension_numbers = #tpu.dot_dimension_numbers<[1], [0], [0], [1], [0, 0, 1, 1], [], []>} : vector<2x16xf32>, vector<16x64xf32>, vector<2x64xf32> -> vector<2x64xf32>
    %343 = arith.addf %341, %342 : vector<2x64xf32>
    %344 = vector.extract_strided_slice %343 {offsets = [0, 0], sizes = [2, 16], strides = [1, 1]} : vector<2x64xf32> to vector<2x16xf32>
    %345 = arith.negf %344 : vector<2x16xf32>
    %346 = math.exp %345 : vector<2x16xf32>
    %cst_102 = arith.constant 1.000000e+00 : f32
    %347 = vector.broadcast %cst_102 : f32 to vector<2x16xf32>
    %348 = arith.addf %347, %346 : vector<2x16xf32>
    %349 = arith.divf %347, %348 : vector<2x16xf32>
    %350 = vector.extract_strided_slice %343 {offsets = [0, 16], sizes = [2, 16], strides = [1, 1]} : vector<2x64xf32> to vector<2x16xf32>
    %351 = arith.negf %350 : vector<2x16xf32>
    %352 = math.exp %351 : vector<2x16xf32>
    %cst_103 = arith.constant 1.000000e+00 : f32
    %353 = vector.broadcast %cst_103 : f32 to vector<2x16xf32>
    %354 = arith.addf %353, %352 : vector<2x16xf32>
    %355 = arith.divf %353, %354 : vector<2x16xf32>
    %356 = vector.extract_strided_slice %343 {offsets = [0, 32], sizes = [2, 16], strides = [1, 1]} : vector<2x64xf32> to vector<2x16xf32>
    %357 = math.tanh %356 : vector<2x16xf32>
    %358 = vector.extract_strided_slice %343 {offsets = [0, 48], sizes = [2, 16], strides = [1, 1]} : vector<2x64xf32> to vector<2x16xf32>
    %359 = arith.negf %358 : vector<2x16xf32>
    %360 = math.exp %359 : vector<2x16xf32>
    %cst_104 = arith.constant 1.000000e+00 : f32
    %361 = vector.broadcast %cst_104 : f32 to vector<2x16xf32>
    %362 = arith.addf %361, %360 : vector<2x16xf32>
    %363 = arith.divf %361, %362 : vector<2x16xf32>
    %364 = arith.mulf %355, %310 : vector<2x16xf32>
    %365 = arith.mulf %349, %357 : vector<2x16xf32>
    %366 = arith.addf %364, %365 : vector<2x16xf32>
    %367 = math.tanh %366 : vector<2x16xf32>
    %368 = arith.mulf %363, %367 : vector<2x16xf32>
    %369 = vector.extract_strided_slice %80 {offsets = [10, 0], sizes = [2, 64], strides = [1, 1]} : vector<16x64xf32> to vector<2x64xf32>
    %cst_105 = arith.constant dense<0.000000e+00> : vector<2x64xf32>
    %370 = tpu.matmul %340, %86, %cst_105 {dimension_numbers = #tpu.dot_dimension_numbers<[1], [0], [0], [1], [0, 0, 1, 1], [], []>} : vector<2x16xf32>, vector<16x64xf32>, vector<2x64xf32> -> vector<2x64xf32>
    %371 = arith.addf %369, %370 : vector<2x64xf32>
    %372 = vector.extract_strided_slice %371 {offsets = [0, 0], sizes = [2, 16], strides = [1, 1]} : vector<2x64xf32> to vector<2x16xf32>
    %373 = arith.negf %372 : vector<2x16xf32>
    %374 = math.exp %373 : vector<2x16xf32>
    %cst_106 = arith.constant 1.000000e+00 : f32
    %375 = vector.broadcast %cst_106 : f32 to vector<2x16xf32>
    %376 = arith.addf %375, %374 : vector<2x16xf32>
    %377 = arith.divf %375, %376 : vector<2x16xf32>
    %378 = vector.extract_strided_slice %371 {offsets = [0, 16], sizes = [2, 16], strides = [1, 1]} : vector<2x64xf32> to vector<2x16xf32>
    %379 = arith.negf %378 : vector<2x16xf32>
    %380 = math.exp %379 : vector<2x16xf32>
    %cst_107 = arith.constant 1.000000e+00 : f32
    %381 = vector.broadcast %cst_107 : f32 to vector<2x16xf32>
    %382 = arith.addf %381, %380 : vector<2x16xf32>
    %383 = arith.divf %381, %382 : vector<2x16xf32>
    %384 = vector.extract_strided_slice %371 {offsets = [0, 32], sizes = [2, 16], strides = [1, 1]} : vector<2x64xf32> to vector<2x16xf32>
    %385 = math.tanh %384 : vector<2x16xf32>
    %386 = vector.extract_strided_slice %371 {offsets = [0, 48], sizes = [2, 16], strides = [1, 1]} : vector<2x64xf32> to vector<2x16xf32>
    %387 = arith.negf %386 : vector<2x16xf32>
    %388 = math.exp %387 : vector<2x16xf32>
    %cst_108 = arith.constant 1.000000e+00 : f32
    %389 = vector.broadcast %cst_108 : f32 to vector<2x16xf32>
    %390 = arith.addf %389, %388 : vector<2x16xf32>
    %391 = arith.divf %389, %390 : vector<2x16xf32>
    %392 = arith.mulf %383, %338 : vector<2x16xf32>
    %393 = arith.mulf %377, %385 : vector<2x16xf32>
    %394 = arith.addf %392, %393 : vector<2x16xf32>
    %395 = math.tanh %394 : vector<2x16xf32>
    %396 = arith.mulf %391, %395 : vector<2x16xf32>
    %397 = vector.extract_strided_slice %85 {offsets = [4, 0], sizes = [2, 64], strides = [1, 1]} : vector<16x64xf32> to vector<2x64xf32>
    %cst_109 = arith.constant dense<0.000000e+00> : vector<2x64xf32>
    %398 = tpu.matmul %368, %87, %cst_109 {dimension_numbers = #tpu.dot_dimension_numbers<[1], [0], [0], [1], [0, 0, 1, 1], [], []>} : vector<2x16xf32>, vector<16x64xf32>, vector<2x64xf32> -> vector<2x64xf32>
    %399 = arith.addf %397, %398 : vector<2x64xf32>
    %400 = vector.extract_strided_slice %399 {offsets = [0, 0], sizes = [2, 16], strides = [1, 1]} : vector<2x64xf32> to vector<2x16xf32>
    %401 = arith.negf %400 : vector<2x16xf32>
    %402 = math.exp %401 : vector<2x16xf32>
    %cst_110 = arith.constant 1.000000e+00 : f32
    %403 = vector.broadcast %cst_110 : f32 to vector<2x16xf32>
    %404 = arith.addf %403, %402 : vector<2x16xf32>
    %405 = arith.divf %403, %404 : vector<2x16xf32>
    %406 = vector.extract_strided_slice %399 {offsets = [0, 16], sizes = [2, 16], strides = [1, 1]} : vector<2x64xf32> to vector<2x16xf32>
    %407 = arith.negf %406 : vector<2x16xf32>
    %408 = math.exp %407 : vector<2x16xf32>
    %cst_111 = arith.constant 1.000000e+00 : f32
    %409 = vector.broadcast %cst_111 : f32 to vector<2x16xf32>
    %410 = arith.addf %409, %408 : vector<2x16xf32>
    %411 = arith.divf %409, %410 : vector<2x16xf32>
    %412 = vector.extract_strided_slice %399 {offsets = [0, 32], sizes = [2, 16], strides = [1, 1]} : vector<2x64xf32> to vector<2x16xf32>
    %413 = math.tanh %412 : vector<2x16xf32>
    %414 = vector.extract_strided_slice %399 {offsets = [0, 48], sizes = [2, 16], strides = [1, 1]} : vector<2x64xf32> to vector<2x16xf32>
    %415 = arith.negf %414 : vector<2x16xf32>
    %416 = math.exp %415 : vector<2x16xf32>
    %cst_112 = arith.constant 1.000000e+00 : f32
    %417 = vector.broadcast %cst_112 : f32 to vector<2x16xf32>
    %418 = arith.addf %417, %416 : vector<2x16xf32>
    %419 = arith.divf %417, %418 : vector<2x16xf32>
    %420 = arith.mulf %411, %366 : vector<2x16xf32>
    %421 = arith.mulf %405, %413 : vector<2x16xf32>
    %422 = arith.addf %420, %421 : vector<2x16xf32>
    %423 = math.tanh %422 : vector<2x16xf32>
    %424 = arith.mulf %419, %423 : vector<2x16xf32>
    %425 = vector.extract_strided_slice %80 {offsets = [12, 0], sizes = [2, 64], strides = [1, 1]} : vector<16x64xf32> to vector<2x64xf32>
    %cst_113 = arith.constant dense<0.000000e+00> : vector<2x64xf32>
    %426 = tpu.matmul %396, %86, %cst_113 {dimension_numbers = #tpu.dot_dimension_numbers<[1], [0], [0], [1], [0, 0, 1, 1], [], []>} : vector<2x16xf32>, vector<16x64xf32>, vector<2x64xf32> -> vector<2x64xf32>
    %427 = arith.addf %425, %426 : vector<2x64xf32>
    %428 = vector.extract_strided_slice %427 {offsets = [0, 0], sizes = [2, 16], strides = [1, 1]} : vector<2x64xf32> to vector<2x16xf32>
    %429 = arith.negf %428 : vector<2x16xf32>
    %430 = math.exp %429 : vector<2x16xf32>
    %cst_114 = arith.constant 1.000000e+00 : f32
    %431 = vector.broadcast %cst_114 : f32 to vector<2x16xf32>
    %432 = arith.addf %431, %430 : vector<2x16xf32>
    %433 = arith.divf %431, %432 : vector<2x16xf32>
    %434 = vector.extract_strided_slice %427 {offsets = [0, 16], sizes = [2, 16], strides = [1, 1]} : vector<2x64xf32> to vector<2x16xf32>
    %435 = arith.negf %434 : vector<2x16xf32>
    %436 = math.exp %435 : vector<2x16xf32>
    %cst_115 = arith.constant 1.000000e+00 : f32
    %437 = vector.broadcast %cst_115 : f32 to vector<2x16xf32>
    %438 = arith.addf %437, %436 : vector<2x16xf32>
    %439 = arith.divf %437, %438 : vector<2x16xf32>
    %440 = vector.extract_strided_slice %427 {offsets = [0, 32], sizes = [2, 16], strides = [1, 1]} : vector<2x64xf32> to vector<2x16xf32>
    %441 = math.tanh %440 : vector<2x16xf32>
    %442 = vector.extract_strided_slice %427 {offsets = [0, 48], sizes = [2, 16], strides = [1, 1]} : vector<2x64xf32> to vector<2x16xf32>
    %443 = arith.negf %442 : vector<2x16xf32>
    %444 = math.exp %443 : vector<2x16xf32>
    %cst_116 = arith.constant 1.000000e+00 : f32
    %445 = vector.broadcast %cst_116 : f32 to vector<2x16xf32>
    %446 = arith.addf %445, %444 : vector<2x16xf32>
    %447 = arith.divf %445, %446 : vector<2x16xf32>
    %448 = arith.mulf %439, %394 : vector<2x16xf32>
    %449 = arith.mulf %433, %441 : vector<2x16xf32>
    %450 = arith.addf %448, %449 : vector<2x16xf32>
    %451 = math.tanh %450 : vector<2x16xf32>
    %452 = arith.mulf %447, %451 : vector<2x16xf32>
    %453 = vector.extract_strided_slice %85 {offsets = [2, 0], sizes = [2, 64], strides = [1, 1]} : vector<16x64xf32> to vector<2x64xf32>
    %cst_117 = arith.constant dense<0.000000e+00> : vector<2x64xf32>
    %454 = tpu.matmul %424, %87, %cst_117 {dimension_numbers = #tpu.dot_dimension_numbers<[1], [0], [0], [1], [0, 0, 1, 1], [], []>} : vector<2x16xf32>, vector<16x64xf32>, vector<2x64xf32> -> vector<2x64xf32>
    %455 = arith.addf %453, %454 : vector<2x64xf32>
    %456 = vector.extract_strided_slice %455 {offsets = [0, 0], sizes = [2, 16], strides = [1, 1]} : vector<2x64xf32> to vector<2x16xf32>
    %457 = arith.negf %456 : vector<2x16xf32>
    %458 = math.exp %457 : vector<2x16xf32>
    %cst_118 = arith.constant 1.000000e+00 : f32
    %459 = vector.broadcast %cst_118 : f32 to vector<2x16xf32>
    %460 = arith.addf %459, %458 : vector<2x16xf32>
    %461 = arith.divf %459, %460 : vector<2x16xf32>
    %462 = vector.extract_strided_slice %455 {offsets = [0, 16], sizes = [2, 16], strides = [1, 1]} : vector<2x64xf32> to vector<2x16xf32>
    %463 = arith.negf %462 : vector<2x16xf32>
    %464 = math.exp %463 : vector<2x16xf32>
    %cst_119 = arith.constant 1.000000e+00 : f32
    %465 = vector.broadcast %cst_119 : f32 to vector<2x16xf32>
    %466 = arith.addf %465, %464 : vector<2x16xf32>
    %467 = arith.divf %465, %466 : vector<2x16xf32>
    %468 = vector.extract_strided_slice %455 {offsets = [0, 32], sizes = [2, 16], strides = [1, 1]} : vector<2x64xf32> to vector<2x16xf32>
    %469 = math.tanh %468 : vector<2x16xf32>
    %470 = vector.extract_strided_slice %455 {offsets = [0, 48], sizes = [2, 16], strides = [1, 1]} : vector<2x64xf32> to vector<2x16xf32>
    %471 = arith.negf %470 : vector<2x16xf32>
    %472 = math.exp %471 : vector<2x16xf32>
    %cst_120 = arith.constant 1.000000e+00 : f32
    %473 = vector.broadcast %cst_120 : f32 to vector<2x16xf32>
    %474 = arith.addf %473, %472 : vector<2x16xf32>
    %475 = arith.divf %473, %474 : vector<2x16xf32>
    %476 = arith.mulf %467, %422 : vector<2x16xf32>
    %477 = arith.mulf %461, %469 : vector<2x16xf32>
    %478 = arith.addf %476, %477 : vector<2x16xf32>
    %479 = math.tanh %478 : vector<2x16xf32>
    %480 = arith.mulf %475, %479 : vector<2x16xf32>
    %481 = vector.extract_strided_slice %80 {offsets = [14, 0], sizes = [2, 64], strides = [1, 1]} : vector<16x64xf32> to vector<2x64xf32>
    %cst_121 = arith.constant dense<0.000000e+00> : vector<2x64xf32>
    %482 = tpu.matmul %452, %86, %cst_121 {dimension_numbers = #tpu.dot_dimension_numbers<[1], [0], [0], [1], [0, 0, 1, 1], [], []>} : vector<2x16xf32>, vector<16x64xf32>, vector<2x64xf32> -> vector<2x64xf32>
    %483 = arith.addf %481, %482 : vector<2x64xf32>
    %484 = vector.extract_strided_slice %483 {offsets = [0, 0], sizes = [2, 16], strides = [1, 1]} : vector<2x64xf32> to vector<2x16xf32>
    %485 = arith.negf %484 : vector<2x16xf32>
    %486 = math.exp %485 : vector<2x16xf32>
    %cst_122 = arith.constant 1.000000e+00 : f32
    %487 = vector.broadcast %cst_122 : f32 to vector<2x16xf32>
    %488 = arith.addf %487, %486 : vector<2x16xf32>
    %489 = arith.divf %487, %488 : vector<2x16xf32>
    %490 = vector.extract_strided_slice %483 {offsets = [0, 16], sizes = [2, 16], strides = [1, 1]} : vector<2x64xf32> to vector<2x16xf32>
    %491 = arith.negf %490 : vector<2x16xf32>
    %492 = math.exp %491 : vector<2x16xf32>
    %cst_123 = arith.constant 1.000000e+00 : f32
    %493 = vector.broadcast %cst_123 : f32 to vector<2x16xf32>
    %494 = arith.addf %493, %492 : vector<2x16xf32>
    %495 = arith.divf %493, %494 : vector<2x16xf32>
    %496 = vector.extract_strided_slice %483 {offsets = [0, 32], sizes = [2, 16], strides = [1, 1]} : vector<2x64xf32> to vector<2x16xf32>
    %497 = math.tanh %496 : vector<2x16xf32>
    %498 = vector.extract_strided_slice %483 {offsets = [0, 48], sizes = [2, 16], strides = [1, 1]} : vector<2x64xf32> to vector<2x16xf32>
    %499 = arith.negf %498 : vector<2x16xf32>
    %500 = math.exp %499 : vector<2x16xf32>
    %cst_124 = arith.constant 1.000000e+00 : f32
    %501 = vector.broadcast %cst_124 : f32 to vector<2x16xf32>
    %502 = arith.addf %501, %500 : vector<2x16xf32>
    %503 = arith.divf %501, %502 : vector<2x16xf32>
    %504 = arith.mulf %495, %450 : vector<2x16xf32>
    %505 = arith.mulf %489, %497 : vector<2x16xf32>
    %506 = arith.addf %504, %505 : vector<2x16xf32>
    %507 = math.tanh %506 : vector<2x16xf32>
    %508 = arith.mulf %503, %507 : vector<2x16xf32>
    %509 = vector.extract_strided_slice %85 {offsets = [0, 0], sizes = [2, 64], strides = [1, 1]} : vector<16x64xf32> to vector<2x64xf32>
    %cst_125 = arith.constant dense<0.000000e+00> : vector<2x64xf32>
    %510 = tpu.matmul %480, %87, %cst_125 {dimension_numbers = #tpu.dot_dimension_numbers<[1], [0], [0], [1], [0, 0, 1, 1], [], []>} : vector<2x16xf32>, vector<16x64xf32>, vector<2x64xf32> -> vector<2x64xf32>
    %511 = arith.addf %509, %510 : vector<2x64xf32>
    %512 = vector.extract_strided_slice %511 {offsets = [0, 0], sizes = [2, 16], strides = [1, 1]} : vector<2x64xf32> to vector<2x16xf32>
    %513 = arith.negf %512 : vector<2x16xf32>
    %514 = math.exp %513 : vector<2x16xf32>
    %cst_126 = arith.constant 1.000000e+00 : f32
    %515 = vector.broadcast %cst_126 : f32 to vector<2x16xf32>
    %516 = arith.addf %515, %514 : vector<2x16xf32>
    %517 = arith.divf %515, %516 : vector<2x16xf32>
    %518 = vector.extract_strided_slice %511 {offsets = [0, 16], sizes = [2, 16], strides = [1, 1]} : vector<2x64xf32> to vector<2x16xf32>
    %519 = arith.negf %518 : vector<2x16xf32>
    %520 = math.exp %519 : vector<2x16xf32>
    %cst_127 = arith.constant 1.000000e+00 : f32
    %521 = vector.broadcast %cst_127 : f32 to vector<2x16xf32>
    %522 = arith.addf %521, %520 : vector<2x16xf32>
    %523 = arith.divf %521, %522 : vector<2x16xf32>
    %524 = vector.extract_strided_slice %511 {offsets = [0, 32], sizes = [2, 16], strides = [1, 1]} : vector<2x64xf32> to vector<2x16xf32>
    %525 = math.tanh %524 : vector<2x16xf32>
    %526 = vector.extract_strided_slice %511 {offsets = [0, 48], sizes = [2, 16], strides = [1, 1]} : vector<2x64xf32> to vector<2x16xf32>
    %527 = arith.negf %526 : vector<2x16xf32>
    %528 = math.exp %527 : vector<2x16xf32>
    %cst_128 = arith.constant 1.000000e+00 : f32
    %529 = vector.broadcast %cst_128 : f32 to vector<2x16xf32>
    %530 = arith.addf %529, %528 : vector<2x16xf32>
    %531 = arith.divf %529, %530 : vector<2x16xf32>
    %532 = arith.mulf %523, %478 : vector<2x16xf32>
    %533 = arith.mulf %517, %525 : vector<2x16xf32>
    %534 = arith.addf %532, %533 : vector<2x16xf32>
    %535 = math.tanh %534 : vector<2x16xf32>
    %536 = arith.mulf %531, %535 : vector<2x16xf32>
    %537 = tpu.concatenate %116, %172, %228, %284, %340, %396, %452, %508 in 1 : vector<2x16xf32>, vector<2x16xf32>, vector<2x16xf32>, vector<2x16xf32>, vector<2x16xf32>, vector<2x16xf32>, vector<2x16xf32>, vector<2x16xf32> -> vector<2x128xf32>
    %538 = tpu.concatenate %536, %480, %424, %368, %312, %256, %200, %144 in 1 : vector<2x16xf32>, vector<2x16xf32>, vector<2x16xf32>, vector<2x16xf32>, vector<2x16xf32>, vector<2x16xf32>, vector<2x16xf32>, vector<2x16xf32> -> vector<2x128xf32>
    %c0_129 = arith.constant 0 : index
    %c0_130 = arith.constant 0 : index
    %539 = vector.load %arg25[%c0_129, %c0_130] : memref<128x8xf32, #tpu.memory_space<vmem>>, vector<128x8xf32>
    %cst_131 = arith.constant dense<0.000000e+00> : vector<2x8xf32>
    %540 = tpu.matmul %537, %539, %cst_131 {dimension_numbers = #tpu.dot_dimension_numbers<[1], [0], [0], [1], [0, 0, 1, 1], [], []>} : vector<2x128xf32>, vector<128x8xf32>, vector<2x8xf32> -> vector<2x8xf32>
    %c0_132 = arith.constant 0 : index
    %c0_133 = arith.constant 0 : index
    %541 = vector.load %arg26[%c0_132, %c0_133] : memref<128x8xf32, #tpu.memory_space<vmem>>, vector<128x8xf32>
    %cst_134 = arith.constant dense<0.000000e+00> : vector<2x8xf32>
    %542 = tpu.matmul %538, %541, %cst_134 {dimension_numbers = #tpu.dot_dimension_numbers<[1], [0], [0], [1], [0, 0, 1, 1], [], []>} : vector<2x128xf32>, vector<128x8xf32>, vector<2x8xf32> -> vector<2x8xf32>
    %543 = arith.addf %540, %542 : vector<2x8xf32>
    %c0_135 = arith.constant 0 : index
    %c0_136 = arith.constant 0 : index
    %544 = vector.load %arg27[%c0_135, %c0_136] : memref<1x1xf32, #tpu.memory_space<vmem>>, vector<1x1xf32>
    %545 = vector.broadcast %544 : vector<1x1xf32> to vector<2x8xf32>
    %546 = arith.addf %543, %545 : vector<2x8xf32>
    %c0_137 = arith.constant 0 : index
    %c0_138 = arith.constant 0 : index
    %547 = vector.load %arg28[%c0_137, %c0_138] : memref<2x8xf32, #tpu.memory_space<vmem>>, vector<2x8xf32>
    tpu.vector_store %arg28[%c0_137, %c0_138], %546 {strides = array<i32>} : memref<2x8xf32, #tpu.memory_space<vmem>>, vector<2x8xf32>,
    return
  }
  func.func @transform_0(%arg0: i32) -> (i32, i32) {
    %c0_i32 = arith.constant 0 : i32
    %c0_i32_0 = arith.constant 0 : i32
    %c0_i32_1 = arith.constant 0 : i32
    return %c0_i32, %c0_i32_0 : i32, i32
  }
  func.func @transform_1(%arg0: i32) -> (i32, i32) {
    %c0_i32 = arith.constant 0 : i32
    %c0_i32_0 = arith.constant 0 : i32
    %c0_i32_1 = arith.constant 0 : i32
    return %c0_i32, %c0_i32_0 : i32, i32
  }
  func.func @transform_2(%arg0: i32) -> (i32, i32) {
    %c0_i32 = arith.constant 0 : i32
    %c0_i32_0 = arith.constant 0 : i32
    %c0_i32_1 = arith.constant 0 : i32
    return %c0_i32, %c0_i32_0 : i32, i32
  }
  func.func @transform_3(%arg0: i32) -> (i32, i32) {
    %c0_i32 = arith.constant 0 : i32
    %c0_i32_0 = arith.constant 0 : i32
    %c0_i32_1 = arith.constant 0 : i32
    return %c0_i32, %c0_i32_0 : i32, i32
  }
  func.func @transform_4(%arg0: i32) -> (i32, i32) {
    %c0_i32 = arith.constant 0 : i32
    %c0_i32_0 = arith.constant 0 : i32
    %c0_i32_1 = arith.constant 0 : i32
    return %c0_i32, %c0_i32_0 : i32, i32
  }
  func.func @transform_5(%arg0: i32) -> (i32, i32) {
    %c0_i32 = arith.constant 0 : i32
    %c0_i32_0 = arith.constant 0 : i32
    %c0_i32_1 = arith.constant 0 : i32
    return %c0_i32, %c0_i32_0 : i32, i32
  }
  func.func @transform_6(%arg0: i32) -> (i32, i32) {
    %c0_i32 = arith.constant 0 : i32
    %c0_i32_0 = arith.constant 0 : i32
    %c0_i32_1 = arith.constant 0 : i32
    return %c0_i32, %c0_i32_0 : i32, i32
  }
  func.func @transform_7(%arg0: i32) -> (i32, i32) {
    %c0_i32 = arith.constant 0 : i32
    %c0_i32_0 = arith.constant 0 : i32
    %c0_i32_1 = arith.constant 0 : i32
    return %c0_i32, %c0_i32_0 : i32, i32
  }
  func.func @transform_8(%arg0: i32) -> (i32, i32) {
    %c0_i32 = arith.constant 0 : i32
    %c0_i32_0 = arith.constant 0 : i32
    %c0_i32_1 = arith.constant 0 : i32
    return %c0_i32, %c0_i32_0 : i32, i32
  }
  func.func @transform_9(%arg0: i32) -> (i32, i32) {
    %c0_i32 = arith.constant 0 : i32
    %c0_i32_0 = arith.constant 0 : i32
    %c0_i32_1 = arith.constant 0 : i32
    return %c0_i32, %c0_i32_0 : i32, i32
  }
  func.func @transform_10(%arg0: i32) -> (i32, i32) {
    %c0_i32 = arith.constant 0 : i32
    %c0_i32_0 = arith.constant 0 : i32
    %c0_i32_1 = arith.constant 0 : i32
    return %c0_i32, %c0_i32_0 : i32, i32
  }
  func.func @transform_11(%arg0: i32) -> (i32, i32) {
    %c0_i32 = arith.constant 0 : i32
    %c0_i32_0 = arith.constant 0 : i32
    %c0_i32_1 = arith.constant 0 : i32
    return %c0_i32, %c0_i32_0 : i32, i32
  }
  func.func @transform_12(%arg0: i32) -> (i32, i32) {
    %c0_i32 = arith.constant 0 : i32
    %c0_i32_0 = arith.constant 0 : i32
    %c0_i32_1 = arith.constant 0 : i32
    return %c0_i32, %c0_i32_0 : i32, i32
  }
  func.func @transform_13(%arg0: i32) -> (i32, i32) {
    %c0_i32 = arith.constant 0 : i32
    %c0_i32_0 = arith.constant 0 : i32
    %c0_i32_1 = arith.constant 0 : i32
    return %c0_i32, %c0_i32_0 : i32, i32
  }
  func.func @transform_14(%arg0: i32) -> (i32, i32) {
    %c0_i32 = arith.constant 0 : i32
    %c0_i32_0 = arith.constant 0 : i32
    %c0_i32_1 = arith.constant 0 : i32
    return %c0_i32, %c0_i32_0 : i32, i32
  }
  func.func @transform_15(%arg0: i32) -> (i32, i32) {
    %c0_i32 = arith.constant 0 : i32
    %c0_i32_0 = arith.constant 0 : i32
    %c0_i32_1 = arith.constant 0 : i32
    return %c0_i32, %c0_i32_0 : i32, i32
  }
  func.func @transform_16(%arg0: i32) -> (i32, i32) {
    %c0_i32 = arith.constant 0 : i32
    %c0_i32_0 = arith.constant 0 : i32
    %c0_i32_1 = arith.constant 0 : i32
    return %c0_i32, %c0_i32_0 : i32, i32
  }
  func.func @transform_17(%arg0: i32) -> (i32, i32) {
    %c0_i32 = arith.constant 0 : i32
    %c0_i32_0 = arith.constant 0 : i32
    %c0_i32_1 = arith.constant 0 : i32
    return %c0_i32, %c0_i32_0 : i32, i32
  }
  func.func @transform_18(%arg0: i32) -> (i32, i32) {
    %c0_i32 = arith.constant 0 : i32
    %c0_i32_0 = arith.constant 0 : i32
    %c0_i32_1 = arith.constant 0 : i32
    return %c0_i32, %c0_i32_0 : i32, i32
  }
  func.func @transform_19(%arg0: i32) -> (i32, i32) {
    %c0_i32 = arith.constant 0 : i32
    %c0_i32_0 = arith.constant 0 : i32
    %c0_i32_1 = arith.constant 0 : i32
    return %c0_i32, %c0_i32_0 : i32, i32
  }
  func.func @transform_20(%arg0: i32) -> (i32, i32) {
    %c0_i32 = arith.constant 0 : i32
    %c0_i32_0 = arith.constant 0 : i32
    %c0_i32_1 = arith.constant 0 : i32
    return %c0_i32, %c0_i32_0 : i32, i32
  }
  func.func @transform_21(%arg0: i32) -> (i32, i32) {
    %c0_i32 = arith.constant 0 : i32
    %c0_i32_0 = arith.constant 0 : i32
    %c0_i32_1 = arith.constant 0 : i32
    return %c0_i32, %c0_i32_0 : i32, i32
  }
  func.func @transform_22(%arg0: i32) -> (i32, i32) {
    %c0_i32 = arith.constant 0 : i32
    %c0_i32_0 = arith.constant 0 : i32
    %c0_i32_1 = arith.constant 0 : i32
    return %c0_i32, %c0_i32_0 : i32, i32
  }
  func.func @transform_23(%arg0: i32) -> (i32, i32) {
    %c0_i32 = arith.constant 0 : i32
    %c0_i32_0 = arith.constant 0 : i32
    %c0_i32_1 = arith.constant 0 : i32
    return %c0_i32, %c0_i32_0 : i32, i32
  }
  func.func @transform_24(%arg0: i32) -> (i32, i32) {
    %c0_i32 = arith.constant 0 : i32
    %c0_i32_0 = arith.constant 0 : i32
    %c0_i32_1 = arith.constant 0 : i32
    return %c0_i32, %c0_i32_0 : i32, i32
  }
  func.func @transform_25(%arg0: i32) -> (i32, i32) {
    %c0_i32 = arith.constant 0 : i32
    %c0_i32_0 = arith.constant 0 : i32
    %c0_i32_1 = arith.constant 0 : i32
    return %c0_i32, %c0_i32_0 : i32, i32
  }
  func.func @transform_26(%arg0: i32) -> (i32, i32) {
    %c0_i32 = arith.constant 0 : i32
    %c0_i32_0 = arith.constant 0 : i32
    %c0_i32_1 = arith.constant 0 : i32
    return %c0_i32, %c0_i32_0 : i32, i32
  }
  func.func @transform_27(%arg0: i32) -> (i32, i32) {
    %c0_i32 = arith.constant 0 : i32
    %c0_i32_0 = arith.constant 0 : i32
    %c0_i32_1 = arith.constant 0 : i32
    return %c0_i32, %c0_i32_0 : i32, i32
  }
  func.func @transform_28(%arg0: i32) -> (i32, i32) {
    %c0_i32 = arith.constant 0 : i32
    %c0_i32_0 = arith.constant 0 : i32
    %c0_i32_1 = arith.constant 0 : i32
    return %c0_i32, %c0_i32_0 : i32, i32
  }
}

</mosaic_0001>

<bundles_post_ra>
// kernel: tpu_custom_call.1
= control target key start
LH: loop header
LB: loop body
LE: loop exit
PB: predicated region body
PF: predicated region fallthrough
CT: control target
= control target key end

     0   :  { %s4524_s0 = inlined_call_operand.vmem [shape: f32[16,16], index: 0, kind: input, shape index: {}]   ;;  %s4525_s1 = inlined_call_operand.vmem [shape: f32[2,32], index: 1, kind: input, shape index: {}]   ;;  %s4526_s2 = inlined_call_operand.vmem [shape: f32[16,12], index: 2, kind: input, shape index: {}]   ;;  %s4527_s3 = inlined_call_operand.vmem [shape: f32[2,3], index: 3, kind: input, shape index: {}]   ;;  %s4528_s4 = inlined_call_operand.vmem [shape: f32[2,2], index: 4, kind: input, shape index: {}]   ;;  %s4529_s5 = inlined_call_operand.vmem [shape: f32[2,16], index: 5, kind: input, shape index: {}]   ;;  %s4530_s6 = inlined_call_operand.vmem [shape: f32[16,32], index: 6, kind: input, shape index: {}]   ;;  %s4531_s7 = inlined_call_operand.vmem [shape: f32[1,32], index: 7, kind: input, shape index: {}]   ;;  %s4532_s8 = inlined_call_operand.vmem [shape: f32[32,32], index: 8, kind: input, shape index: {}]   ;;  %s4533_s9 = inlined_call_operand.vmem [shape: f32[1,32], index: 9, kind: input, shape index: {}]   ;;  %s4534_s10 = inlined_call_operand.vmem [shape: f32[12,32], index: 10, kind: input, shape index: {}]   ;;  %s4535_s11 = inlined_call_operand.vmem [shape: f32[1,32], index: 11, kind: input, shape index: {}]   ;;  %s4536_s12 = inlined_call_operand.vmem [shape: f32[3,32], index: 12, kind: input, shape index: {}]   ;;  %s4537_s13 = inlined_call_operand.vmem [shape: f32[1,32], index: 13, kind: input, shape index: {}]   ;;  %s4538_s14 = inlined_call_operand.vmem [shape: f32[34,32], index: 14, kind: input, shape index: {}]   ;;  %s4539_s15 = inlined_call_operand.vmem [shape: f32[1,32], index: 15, kind: input, shape index: {}]   ;;  %s4540_s16 = inlined_call_operand.vmem [shape: f32[32,4], index: 16, kind: input, shape index: {}]   ;;  %s4541_s17 = inlined_call_operand.vmem [shape: f32[1,4], index: 17, kind: input, shape index: {}]   ;;  %s4542_s18 = inlined_call_operand.vmem [shape: f32[32,64], index: 18, kind: input, shape index: {}]   ;;  %s4543_s19 = inlined_call_operand.vmem [shape: f32[16,64], index: 19, kind: input, shape index: {}]   ;;  %s4544_s20 = inlined_call_operand.vmem [shape: f32[1,64], index: 20, kind: input, shape index: {}]   ;;  %s4545_s21 = inlined_call_operand.vmem [shape: f32[32,64], index: 21, kind: input, shape index: {}]   ;;  %s4546_s22 = inlined_call_operand.vmem [shape: f32[16,64], index: 22, kind: input, shape index: {}]   ;;  %s4547_s23 = inlined_call_operand.vmem [shape: f32[1,64], index: 23, kind: input, shape index: {}]   ;;  %s4548_s24 = inlined_call_operand.vmem [shape: f32[128,8], index: 24, kind: input, shape index: {}]   ;;  %s4549_s25 = inlined_call_operand.vmem [shape: f32[128,8], index: 25, kind: input, shape index: {}]   ;;  %s4550_s26 = inlined_call_operand.<no memory space> [shape: f32[1,1], index: 26, kind: input, shape index: {}]   ;;  %s4551_s27 = inlined_call_operand.hbm [shape: f32[2,8], index: 27, kind: output, shape index: {0}]   ;;  %s4552_s28 = inlined_call_operand.hbm [shape: f32[2,4], index: 28, kind: output, shape index: {1}]  }
   0x1   :  { %4558 = sst [smem:[#allocation9_spill]] %s4524_s0  ;;  %v34_v0 = vstv %s4550_s26 }
   0x2   :  { %4559 = sst [smem:[#allocation10_spill]] %s4525_s1  ;;  %35 = vst [vmem:[#allocation2] sm:$0x1] %v34_v0 }
   0x3   :  { %4560 = sst [smem:[#allocation11_spill]] %s4526_s2 }
   0x4   :  { %4561 = sst [smem:[#allocation12_spill]] %s4527_s3 }
   0x5   :  { %4562 = sst [smem:[#allocation13_spill]] %s4528_s4 }
   0x6   :  { %4563 = sst [smem:[#allocation14_spill]] %s4529_s5 }
   0x7   :  { %4564 = sst [smem:[#allocation15_spill]] %s4530_s6 }
   0x8   :  { %4565 = sst [smem:[#allocation16_spill]] %s4531_s7 }
   0x9   :  { %4566 = sst [smem:[#allocation17_spill]] %s4532_s8 }
   0xa   :  { %4567 = sst [smem:[#allocation18_spill]] %s4533_s9 }
   0xb   :  { %4568 = sst [smem:[#allocation19_spill]] %s4534_s10 }
   0xc   :  { %4569 = sst [smem:[#allocation20_spill]] %s4535_s11 }
   0xd   :  { %4570 = sst [smem:[#allocation21_spill]] %s4536_s12 }
   0xe   :  { %36 = vsyncpa [#allocation4], 0  ;;  %s4571_s3 = sld [smem:[#allocation15_spill]]  ;;  %s4572_s29 = sld [smem:[#allocation9_spill]]  ;;  %vm103_vm0 = vcmask 130048   ;;  %vm205_vm1 = vcmask 1043456  }
   0xf   :  { %s4573_s7 = sld [smem:[#allocation19_spill]]  ;;  %vm3737_vm2 = vmmov 1  }
  0x10   :  { %vm3367_vm3 = vmpackc.low %vm205_vm1, %vm3737_vm2 }
  0x14   :  { %v94_v1 = vld [vmem:[%s4571_s3] sm:$0xff]  ;;  %v95_v2 = vld [vmem:[%s4571_s3 + $0x8] sm:$0xff] }
  0x15   :  { %v92_v3 = vld [vmem:[%s4572_s29] sm:$0xff]  ;;  %v3362_v4 = vpack.c.bf16 %v95_v2, %v94_v1  ;;  %v190_v6 = vld [vmem:[%s4573_s7 + $0x8] sm:$0xf] }
  0x16   :  { %3101 = vmatprep.mubr.msk.f32.mxu0 %vm103_vm0, %v92_v3  ;;  %v189_v5 = vld [vmem:[%s4573_s7] sm:$0xff] }
  0x17   :  { %v3366_v7 = vpack.c.bf16 %v190_v6, %v189_v5  ;;  %3363 = vmatprep.subr.bf16.mxu0 %v3362_v4 }
  0x18   :  { %37 = vsyncpa [#allocation6], 0  ;;  %3365 = vmatpush3.bf16.msra.mxu0 %v3362_v4  ;;  %v93_v8 = vld [vmem:[%s4572_s29 + $0x8] sm:$0xff]  ;;  %s4574_s30 = sld [smem:[#allocation11_spill]]  ;;  %vm198_vm4 = vcmask 97280   ;;  %v3738_v11 = vmov 0.0  }
  0x19   :  { %3368 = vmatprep.subr.msk.bf16.mxu1 %vm3367_vm3, %v3366_v7  ;;  %s4575_s11 = sld [smem:[#allocation21_spill]]  ;;  %vm386_vm5 = vcmask 1042432   ;;  %vm3739_vm6 = vmmov 0   ;;  %s4576_s2 = sld [smem:[#allocation12_spill]]  ;;  %vm382_vm7 = vcmask 23552   ;;  %v3740_v14 = vmov 0.0|0.0  }
  0x1a   :  { %3371 = vmatpush3.bf16.msk.msra.mxu1 %vm3367_vm3, %v3366_v7  ;;  %3372 = vmatprep.subr.bf16.mxu0 %v3740_v14  ;;  %s4577_s1 = sld [smem:[#allocation13_spill]]  ;;  %s4578_s5 = sld [smem:[#allocation17_spill]]  ;;  %vm298_vm8 = vcmask 261120   ;;  %v541_v23 = vld [vmem:[%s4538_s14] sm:$0xff]  ;;  %v542_v24 = vld [vmem:[%s4538_s14 + $0x8] sm:$0xff]  ;;  %v543_v26 = vld [vmem:[%s4538_s14 + $0x10] sm:$0xff] }
  0x1b   :  { %3102 = vmatmul.mubr.msk.f32.vlgmr.msra.gmra.mrb[0].mxu0 %vm103_vm0, %v93_v8  ;;  %3122 = vmatprep.subr.mxu1 %v3738_v11  ;;  %s3741_s3 = smov 32   ;;  %v3382_v25 = vpack.c.bf16 %v542_v24, %v541_v23  ;;  %v544_v27 = vld [vmem:[%s4538_s14 + $0x18] sm:$0xff]  ;;  %s4580_s0 = sld [smem:[#allocation16_spill]]  ;;  %v545_v42 = vld [vmem:[%s4538_s14 + $0x20] sm:$0x3]  ;;  %vm557_vm9 = vcmask 1041408  }
  0x1c   :  { %3119 = vmatprep.mubr.msk.f32.mxu0 %vm3739_vm6, %v3738_v11  ;;  %v3385_v28 = vpack.c.bf16 %v544_v27, %v543_v26  ;;  %s4581_s26 = sld [smem:[#allocation14_spill]]  ;;  %v632_v43 = vld [vmem:[%s4540_s16] sm:$0xff]  ;;  %v633_v44 = vld [vmem:[%s4540_s16 + $0x8] sm:$0xff]  ;;  %vm553_vm10 = vcmask 277504   ;;  %v634_v52 = vld [vmem:[%s4540_s16 + $0x10] sm:$0xff]  ;;  %vm716_vm11 = vcmask 25600  }
  0x1d   :  { %v3388_v45 = vpack.c.bf16 %v633_v44, %v632_v43  ;;  %v635_v53 = vld [vmem:[%s4540_s16 + $0x18] sm:$0xff]  ;;  %v2932_v55 = vld [vmem:[%s4539_s15] ss:$0 sm:$0xff]  ;;  %v3742_v6 = vmov 1   ;;  %v3743_v7 = vmov 0   ;;  %vm738_vm12 = vcmask 1045504  }
  0x1e   :  { %v187_v9 = vld [vmem:[%s4574_s30] sm:$0xff]  ;;  %v188_v10 = vld [vmem:[%s4574_s30 + $0x8] sm:$0xff]  ;;  %v3391_v54 = vpack.c.bf16 %v635_v53, %v634_v52  ;;  %3522 = vset.pattern.permute.xlu1 %v3742_v6  ;;  %3556 = vset.pattern.permute.xlu0 %v3743_v7  ;;  %v3745_v26 = vmov 2   ;;  %v780_v27 = vld [vmem:[%s4542_s18 + $0x10] sm:$0xff]  ;;  %s4582_s15 = sld [smem:[#allocation18_spill]]  ;;  %s3749_s10 = smov 112  }
  0x1f   :  { %3108 = vmatprep.mubr.msk.f32.mxu1 %vm198_vm4, %v187_v9  ;;  %v374_v12 = vld [vmem:[%s4575_s11] sm:$0x7]  ;;  %v871_v24 = vld [vmem:[%s4545_s21 + $0x8] sm:$0xff]  ;;  %vm2666_vm13 = vcmask 392192   ;;  %vm2668_vm14 = vcmask 523264   ;;  %vm2670_vm15 = vcmask 654336  }
  0x20   :  { %3109 = vmatmul.mubr.msk.f32.vlgmr.msra.gmra.mrb[0].mxu1 %vm198_vm4, %v188_v10  ;;  %v373_v13 = vld [vmem:[%s4576_s2] sm:$0x3]  ;;  %v288_v17 = vld [vmem:[%s4578_s5 + $0x8] sm:$0xff]  ;;  %v289_v19 = vld [vmem:[%s4578_s5 + $0x10] sm:$0xff]  ;;  %s4579_s2 = sld [smem:[#allocation10_spill]] }
  0x21   :  { %3123 = vmatpush3.msk.msra.mxu1 %vm386_vm5, %v374_v12  ;;  %3124 = vmatprep.mubr.msk.f32.mxu1 %vm3739_vm6, %v3738_v11  ;;  %v535_v15 = vld [vmem:[%s4577_s1] sm:$0x3]  ;;  %v290_v20 = vld [vmem:[%s4578_s5 + $0x18] sm:$0xff] }
  0x22   :  { %3378 = vmatprep.subr.bf16.mxu1 %v3740_v14  ;;  %v287_v16 = vld [vmem:[%s4578_s5] sm:$0xff]  ;;  %537 = vrot.lane.b32.xlu0 %v535_v15, %s3741_s3  ;;  %v3376_v21 = vpack.c.bf16 %v290_v20, %v289_v19  ;;  %s3748_s5 = smov 80  }
  0x23   :  { %v3373_v18 = vpack.c.bf16 %v288_v17, %v287_v16  ;;  %v2919_v29 = vld [vmem:[%s4580_s0] ss:$0 sm:$0xff]  ;;  %v3744_v16 = vmov 3  }
  0x24   :  { %3125 = vmatmul.mubr.msk.f32.vlgmr.msra.gmra.mrb[2].mxu1 %vm382_vm7, %v373_v13  ;;  %v461_v37 = vld [vmem:[%s4581_s26] sm:$0x3] }
  0x25   :  { %3131 = vmatprep.mubr.msk.f32.mxu1 %vm3739_vm6, %v3738_v11  ;;  %3374 = vmatpush3.bf16.msra.mxu0 %v3373_v18  ;;  %v2935_v60 = vld [vmem:[%s4541_s17] ss:$0 sm:$0xff]  ;;  %s4583_s17 = sld [smem:[#allocation20_spill]] }
  0x26   :  { %3375 = vmatprep.subr.bf16.mxu0 %v3740_v14  ;;  %v286_v22 = vld [vmem:[%s4579_s2] sm:$0x3] }
  0x27   :  { %v778_v20 = vld [vmem:[%s4542_s18] sm:$0xff] }
  0x29   :  { %3377 = vmatpush3.bf16.msra.mxu0 %v3376_v21  ;;  %v779_v21 = vld [vmem:[%s4542_s18 + $0x8] sm:$0xff] }
  0x2a   :  { %3381 = vmatprep.subr.bf16.mxu0 %v3740_v14  ;;  %v3393_v23 = vpack.c.bf16 %v779_v21, %v778_v20 }
  0x2c   :  { %3120 = vmatmul.mubr.msk.f32.vlgmr.msra.gmra.mrb[2].mxu0 %vm298_vm8, %v286_v22  ;;  %v870_v22 = vld [vmem:[%s4545_s21] sm:$0xff] }
  0x2d   :  { %3144 = vmatprep.mubr.msk.f32.mxu0 %vm3739_vm6, %v3738_v11  ;;  %3383 = vmatpush3.bf16.msra.mxu0 %v3382_v25  ;;  %v3401_v25 = vpack.c.bf16 %v871_v24, %v870_v22 }
  0x2e   :  { %3384 = vmatprep.subr.bf16.mxu0 %v3740_v14 }
  0x31   :  { %3386 = vmatpush3.bf16.msra.mxu0 %v3385_v28  ;;  %v781_v28 = vld [vmem:[%s4542_s18 + $0x18] sm:$0xff] }
  0x32   :  { %3142 = vmatprep.subr.mxu0 %v3738_v11 }
  0x35   :  { %3143 = vmatpush3.msk.msra.mxu0 %vm557_vm9, %v545_v42 }
  0x36   :  { %3402 = vmatprep.subr.bf16.mxu0 %v3401_v25 }
  0x94   :  { %v538_v48 = vpop.permute.xlu0 %537 }
  0xee   :  { %v3103_v30 = vpop.f32.mrb[0].mxu0 }
  0xef   :  { %v3985_v31 = vadd.f32 %v3103_v30, %v2919_v29  ;;  %v176_v32 = vpop.f32.mrb[1].mxu0  ;;  %v3397_v30 = vpack.c.bf16 %v781_v28, %v780_v27 }
  0xf0   :  { %v3987_v33 = vadd.f32 %v2919_v29, %v176_v32  ;;  %v872_v29 = vld [vmem:[%s4545_s21 + $0x10] sm:$0xff]  ;;  %v873_v32 = vld [vmem:[%s4545_s21 + $0x18] sm:$0xff] }
  0xf1   :  { %v186_v34 = vmax.f32 %v3985_v31, 0.0  ;;  %v959_v31 = vld [vmem:[%s4546_s22 + $0x8] sm:$0xff] }
  0xf2   :  { %v185_v35 = vmax.f32 %v3987_v33, 0.0  ;;  %v958_v33 = vld [vmem:[%s4546_s22] sm:$0xff] }
  0xf3   :  { %v4002_v38 = vpop.f32.mrb[0].mxu1  ;;  %v4101_v6 = vpack.c.bf16 %v959_v31, %v958_v33 }
  0xf4   :  { %v3379_v36 = vpack.c.bf16 %v186_v34, %v185_v35  ;;  %v4004_v39 = vpop.f32.mrb[1].mxu1 }
  0xf6   :  { %3380 = vmatpush3.bf16.msra.mxu1 %v3379_v36  ;;  %v3405_v36 = vpack.c.bf16 %v873_v32, %v872_v29 }
  0xf7   :  { %3387 = vmatprep.subr.bf16.mxu1 %v3740_v14  ;;  %v4006_v40 = vpop.f32.mrb[2].mxu1 }
  0xf8   :  { %v3126_v41 = vpop.f32.mrb[3].mxu1 }
  0xf9   :  { %3132 = vmatmul.mubr.msk.f32.vlgmr.msra.gmra.mrb[4].mxu1 %vm103_vm0, %v461_v37  ;;  %v2928_v37 = vld [vmem:[%s4537_s13] ss:$0 sm:$0xff] }
  0xfa   :  { %3155 = vmatprep.mubr.msk.f32.mxu1 %vm3739_vm6, %v3738_v11  ;;  %3389 = vmatpush3.bf16.msra.mxu1 %v3388_v45  ;;  %v2926_v41 = vld [vmem:[%s4582_s15] ss:$0 sm:$0xff]  ;;  %v457_v42 = vadd.f32 %v2928_v37, %v4006_v40 }
  0xfb   :  { %3390 = vmatprep.subr.bf16.mxu1 %v3740_v14 }
  0xfc   :  { %v460_v45 = vmax.f32 %v457_v42, 0.0 }
  0xfe   :  { %3392 = vmatpush3.bf16.msra.mxu1 %v3391_v54 }
  0xff   :  { %v4019_v46 = vpop.f32.mrb[2].mxu0  ;;  %3394 = vmatprep.subr.bf16.mxu1 %v3393_v23 }
 0x100   :  { %v3121_v47 = vpop.f32.mrb[3].mxu0  ;;  %v369_v43 = vadd.f32 %v2926_v41, %v4019_v46 }
 0x102   :  { %v372_v47 = vmax.f32 %v369_v43, 0.0 }
 0x1cc   :  { %v531_v49 = vpop.f32.mrb[4].mxu1 }
 0x1cd   :  { %v540_v50 = vsel %vm298_vm8, %v531_v49, %v538_v48  ;;  %v3133_v51 = vpop.f32.mrb[5].mxu1 }
 0x1ce   :  { %3145 = vmatmul.mubr.msk.f32.vlgmr.msra.gmra.mrb[4].mxu0 %vm553_vm10, %v540_v50  ;;  %v2922_v51 = vld [vmem:[%s4583_s17] ss:$0 sm:$0xff] }
 0x1cf   :  { %3404 = vmatpush3.bf16.msra.mxu0 %v3401_v25  ;;  %v281_v53 = vadd.f32 %v4002_v38, %v2922_v51  ;;  %v276_v54 = vadd.f32 %v2922_v51, %v4004_v39  ;;  %v956_v39 = vld [vmem:[%s4543_s19] sm:$0xff] }
 0x1d0   :  { %3406 = vmatprep.subr.bf16.mxu0 %v3405_v36 }
 0x1d3   :  { %3408 = vmatpush3.bf16.msra.mxu0 %v3405_v36 }
 0x1d4   :  { %3412 = vmatprep.subr.bf16.mxu0 %v3740_v14 }
 0x2a1   :  { %v627_v56 = vpop.f32.mrb[4].mxu0 }
 0x2a2   :  { %v628_v57 = vadd.f32 %v2932_v55, %v627_v56  ;;  %v3146_v58 = vpop.f32.mrb[5].mxu0 }
 0x2a3   :  { %v284_v58 = vmax.f32 %v276_v54, 0.0 }
 0x2a4   :  { %v631_v59 = vmax.f32 %v628_v57, 0.0  ;;  %v285_v57 = vmax.f32 %v281_v53, 0.0 }
 0x2a6   :  { %3156 = vmatmul.mubr.msk.f32.vlgmr.msra.gmra.mrb[6].mxu1 %vm298_vm8, %v631_v59 }
 0x2a7   :  { %3396 = vmatpush3.bf16.msra.mxu1 %v3393_v23 }
 0x2a8   :  { %3398 = vmatprep.subr.bf16.mxu1 %v3397_v30 }
 0x2ab   :  { %3400 = vmatpush3.bf16.msra.mxu1 %v3397_v30 }
 0x2ac   :  { %3409 = vmatprep.subr.bf16.mxu1 %v3740_v14 }
 0x379   :  { %v712_v61 = vpop.f32.mrb[6].mxu1 }
 0x37a   :  { %v713_v62 = vadd.f32 %v2935_v60, %v712_v61  ;;  %v3157_v63 = vpop.f32.mrb[7].mxu1 }
 0x37c   :  { %v717_v0 = vsel %vm716_vm11, %v713_v62, -inf }
 0x37d   :  { %718 = vmax.xlane.f32.xlu0 %v717_v0 }
 0x40a   :  { %v719_v1 = vpop.xlane.xlu0 %718 }
 0x40b   :  { %v720_v2 = vsub.f32 %v713_v62, %v719_v1  ;;  %v957_v1 = vld [vmem:[%s4543_s19 + $0x8] sm:$0xff] }
 0x40d   :  { %v721_v3 = vmul.f32 1.442695, %v720_v2 }
 0x40f   :  { %3557 = vpow2.f32 %v721_v3 }
 0x419   :  { %v3558_v4 = vpop.eup %3557 }
 0x41a   :  { %v723_v5 = vsel %vm716_vm11, %v3558_v4, 0.0 }
 0x41b   :  { %724 = vadd.xlane.f32.xlu1 %v723_v5  ;;  %v4099_v5 = vpack.c.bf16 %v957_v1, %v956_v39 }
 0x4a8   :  { %v725_v8 = vpop.xlane.xlu1 %724 }
 0x4a9   :  { %3559 = vrcp.f32 %v725_v8  ;;  %v2940_v8 = vld [vmem:[%s4547_s23] ss:$0 sm:$0xff]  ;;  %s3747_s23 = smov 16  }
 0x4b3   :  { %v3560_v9 = vpop.eup %3559 }
 0x4b4   :  { %v727_v10 = vmul.f32 %v3560_v9, %v3558_v4 }
 0x4b6   :  { %728 = vst.msk [vmem:[#allocation5] sm:$0x3] %vm716_vm11, %v727_v10  ;;  %741 = vperm.xlu1 %3522, %v727_v10   ;;  %v730_v12 = vrot.slane %v727_v10, 6  ;;  %v732_v13 = vrot.slane %v727_v10, 4  ;;  %v734_v18 = vrot.slane %v727_v10, 2 }
 0x4b8   :  { %v736_v15 = vsel %vm557_vm9, %v727_v10, %v730_v12 }
 0x4b9   :  { %v737_v17 = vsel %vm205_vm1, %v736_v15, %v732_v13 }
 0x4ba   :  { %3523 = vset.pattern.permute.xlu1 %v3744_v16  ;;  %v739_v19 = vsel %vm738_vm12, %v737_v17, %v734_v18 }
 0x4bb   :  { %746 = vperm.xlu1 %3523, %v727_v10  }
 0x4bf   :  { %3524 = vset.pattern.permute.xlu1 %v3743_v7  ;;  %v2937_v7 = vld [vmem:[%s4544_s20] ss:$0 sm:$0xff]  ;;  %s3746_s20 = smov 96  }
 0x4c0   :  { %753 = vperm.xlu1 %3524, %v739_v19  }
 0x4c4   :  { %3525 = vset.pattern.permute.xlu1 %v3745_v26 }
 0x4c5   :  { %759 = vperm.xlu1 %3525, %v739_v19  }
 0x535   :  { %v742_v44 = vpop.permute.xlu1 %741 }
 0x536   :  { %v744_v49 = vmul.f32 %v742_v44, %v372_v47 }
 0x53a   :  { %v747_v48 = vpop.permute.xlu1 %746 }
 0x53b   :  { %v749_v50 = vmul.f32 %v747_v48, %v460_v45 }
 0x53d   :  { %v750_v52 = vadd.f32 %v749_v50, %v744_v49 }
 0x53f   :  { %v767_v55 = vrot.slane %v750_v52, 6  ;;  %v754_v56 = vpop.permute.xlu1 %753  ;;  %v769_v40 = vrot.slane %v750_v52, 4  ;;  %v771_v0 = vrot.slane %v750_v52, 2 }
 0x540   :  { %v756_v59 = vmul.f32 %v754_v56, %v185_v35  ;;  %v757_v61 = vmul.f32 %v754_v56, %v186_v34 }
 0x541   :  { %v773_v46 = vsel %vm557_vm9, %v750_v52, %v767_v55 }
 0x542   :  { %v774_v62 = vsel %vm205_vm1, %v773_v46, %v769_v40  ;;  %vm2674_vm1 = vcmask 916480  }
 0x543   :  { %v775_v2 = vsel %vm738_vm12, %v774_v62, %v771_v0 }
 0x544   :  { %v760_v60 = vpop.permute.xlu1 %759 }
 0x545   :  { %v762_v63 = vmul.f32 %v760_v60, %v284_v58  ;;  %v763_v38 = vmul.f32 %v760_v60, %v285_v57 }
 0x547   :  { %v764_v34 = vadd.f32 %v762_v63, %v756_v59  ;;  %v765_v35 = vadd.f32 %v763_v38, %v757_v61 }
 0x549   :  { %v776_v3 = vadd.f32 %v775_v2, %v764_v34  ;;  %v777_v4 = vadd.f32 %v775_v2, %v765_v35 }
 0x54b   :  { %3166 = vmatprep.mubr.msk.f32.mxu1 %vm298_vm8, %v776_v3  ;;  %3177 = vmatprep.mubr.msk.f32.mxu0 %vm298_vm8, %v776_v3 }
 0x54c   :  { %3167 = vmatmul.mubr.msk.f32.vlgmr.msra.gmra.mrb[8].mxu1 %vm298_vm8, %v777_v4  ;;  %3178 = vmatmul.mubr.msk.f32.vlgmr.msra.gmra.mrb[6].mxu0 %vm298_vm8, %v777_v4 }
 0x54d   :  { %3411 = vmatpush3.bf16.msra.mxu1 %v4099_v5  ;;  %3414 = vmatpush3.bf16.msra.mxu0 %v4101_v6 }
 0x54e   :  { %3184 = vmatprep.mubr.msk.f32.mxu1 %vm3739_vm6, %v3738_v11  ;;  %3191 = vmatprep.mubr.msk.f32.mxu0 %vm3739_vm6, %v3738_v11 }
 0x54f   :  { %3418 = vmatprep.subr.bf16.mxu0 %v3740_v14  ;;  %3415 = vmatprep.subr.bf16.mxu1 %v3740_v14 }
 0x550   :  { %3185 = vmatmul.mubr.f32.vlgmr.msra.gmra.mrb[10].mxu1 %v3738_v11  ;;  %3192 = vmatmul.mubr.f32.vlgmr.msra.gmra.mrb[8].mxu0 %v3738_v11 }
 0x551   :  { %3420 = vmatpush3.bf16.msra.mxu0 %v4101_v6  ;;  %3417 = vmatpush3.bf16.msra.mxu1 %v4099_v5 }
 0x552   :  { %3205 = vmatprep.mubr.msk.f32.mxu0 %vm3739_vm6, %v3738_v11  ;;  %3198 = vmatprep.mubr.msk.f32.mxu1 %vm3739_vm6, %v3738_v11 }
 0x553   :  { %3424 = vmatprep.subr.bf16.mxu0 %v3740_v14  ;;  %3421 = vmatprep.subr.bf16.mxu1 %v3740_v14 }
 0x61f   :  { %v3168_v9 = vpop.f32.mrb[8].mxu1  ;;  %v3179_v10 = vpop.f32.mrb[6].mxu0 }
 0x620   :  { %v4131_v12 = vadd.f32 %v3168_v9, %v2937_v7  ;;  %v861_v13 = vpop.f32.mrb[9].mxu1  ;;  %v947_v15 = vpop.f32.mrb[7].mxu0  ;;  %v4137_v20 = vadd.f32 %v3179_v10, %v2940_v8 }
 0x621   :  { %v4133_v16 = vadd.f32 %v2937_v7, %v861_v13  ;;  %v4135_v17 = vadd.f32 %v2940_v8, %v947_v15 }
 0x623   :  { %v1029_v18 = vpop.f32.mrb[10].mxu1  ;;  %v1124_v19 = vpop.f32.mrb[8].mxu0 }
 0x624   :  { %v1033_v21 = vadd.f32 %v1029_v18, %v4133_v16  ;;  %v1129_v22 = vrot.slane %v1124_v19, 2  ;;  %v3193_v23 = vpop.f32.mrb[9].mxu0  ;;  %v3186_v24 = vpop.f32.mrb[11].mxu1 }
 0x626   :  { %3561 = vtanh.f32 %v1033_v21  ;;  %v1131_v25 = vadd.f32 %v1129_v22, %v4137_v20  ;;  %v2943_v29 = vmul.f32 -1.442695, %v1033_v21 }
 0x628   :  { %3563 = vtanh.f32 %v1131_v25  ;;  %v2944_v28 = vmul.f32 -1.442695, %v1131_v25 }
 0x62a   :  { %3565 = vpow2.f32 %v2944_v28 }
 0x62b   :  { %3567 = vpow2.f32 %v2943_v29 }
 0x630   :  { %v3562_v26 = vpop.eup %3561 }
 0x631   :  { %1043 = vrot.lane.b32.xlu0 %v3562_v26, %s3746_s20 }
 0x632   :  { %v3564_v27 = vpop.eup %3563 }
 0x633   :  { %1141 = vrot.lane.b32.xlu1 %v3564_v27, %s3746_s20 }
 0x634   :  { %v3566_v30 = vpop.eup %3565 }
 0x635   :  { %v1135_v32 = vadd.f32 1.0, %v3566_v30  ;;  %v3568_v36 = vpop.eup %3567 }
 0x636   :  { %v1037_v37 = vadd.f32 1.0, %v3568_v36 }
 0x637   :  { %3569 = vrcp.f32 %v1135_v32 }
 0x638   :  { %3571 = vrcp.f32 %v1037_v37 }
 0x641   :  { %v3570_v41 = vpop.eup %3569 }
 0x642   :  { %v3572_v45 = vpop.eup %3571  ;;  %v1139_v48 = vmul.f32 0.0, %v3570_v41 }
 0x643   :  { %v1041_v51 = vmul.f32 0.0, %v3572_v45 }
 0x6a3   :  { %v1044_v44 = vpop.permute.xlu0 %1043 }
 0x6a4   :  { %v1046_v47 = vmul.f32 %v3572_v45, %v1044_v44 }
 0x6a5   :  { %v1142_v42 = vpop.permute.xlu1 %1141 }
 0x6a6   :  { %v1144_v43 = vmul.f32 %v3570_v41, %v1142_v42 }
 0x6a8   :  { %1146 = vrot.lane.b32.xlu1 %v1144_v43, %s3747_s23 }
 0x6ac   :  { %1048 = vrot.lane.b32.xlu1 %v1046_v47, %s3747_s23 }
 0x71a   :  { %v1147_v49 = vpop.permute.xlu1 %1146 }
 0x71b   :  { %v1149_v50 = vadd.f32 %v1147_v49, %v1139_v48 }
 0x71d   :  { %3573 = vtanh.f32 %v1149_v50  ;;  %v1350_v21 = vrot.slane %v1149_v50, 2 }
 0x71e   :  { %v1049_v52 = vpop.permute.xlu1 %1048 }
 0x71f   :  { %v1051_v53 = vadd.f32 %v1049_v52, %v1041_v51 }
 0x721   :  { %3575 = vtanh.f32 %v1051_v53  ;;  %v1243_v23 = vrot.slane %v1051_v53, 6 }
 0x727   :  { %v3574_v54 = vpop.eup %3573 }
 0x728   :  { %1152 = vrot.lane.b32.xlu1 %v3574_v54, %s3741_s3 }
 0x72b   :  { %v3576_v55 = vpop.eup %3575 }
 0x72c   :  { %1054 = vrot.lane.b32.xlu1 %v3576_v55, %s3741_s3 }
 0x79a   :  { %v1153_v56 = vpop.permute.xlu1 %1152 }
 0x79b   :  { %v4147_v40 = vmul.f32 %v3570_v41, %v1153_v56 }
 0x79d   :  { %v1263_v46 = vrot.slane %v4147_v40, 6 }
 0x79e   :  { %v1055_v57 = vpop.permute.xlu1 %1054 }
 0x79f   :  { %v1057_v58 = vmul.f32 %v3572_v45, %v1055_v57  ;;  %1264 = vrot.lane.b32.xlu1 %v1263_v46, %s3748_s5 }
 0x7a1   :  { %1157 = vrot.lane.b32.xlu0 %v1057_v58, %s3748_s5 }
 0x811   :  { %v1265_v59 = vpop.permute.xlu1 %1264 }
 0x812   :  { %3206 = vmatmul.mubr.msk.f32.vlgmr.msra.gmra.mrb[10].mxu0 %vm103_vm0, %v1265_v59 }
 0x813   :  { %v4155_v60 = vpop.permute.xlu0 %1157  ;;  %3426 = vmatpush3.bf16.msra.mxu0 %v4101_v6  ;;  %3219 = vmatprep.mubr.msk.f32.mxu0 %vm3739_vm6, %v3738_v11 }
 0x814   :  { %3199 = vmatmul.mubr.msk.f32.vlgmr.msra.gmra.mrb[12].mxu1 %vm103_vm0, %v4155_v60  ;;  %3430 = vmatprep.subr.bf16.mxu0 %v3740_v14 }
 0x815   :  { %3423 = vmatpush3.bf16.msra.mxu1 %v4099_v5  ;;  %3212 = vmatprep.mubr.msk.f32.mxu1 %vm3739_vm6, %v3738_v11 }
 0x816   :  { %3427 = vmatprep.subr.bf16.mxu1 %v3740_v14 }
 0x8e5   :  { %v1334_v61 = vpop.f32.mrb[10].mxu0 }
 0x8e6   :  { %v1339_v62 = vrot.slane %v1334_v61, 4  ;;  %v3207_v63 = vpop.f32.mrb[11].mxu0 }
 0x8e7   :  { %v1227_v38 = vpop.f32.mrb[12].mxu1 }
 0x8e8   :  { %v1341_v39 = vadd.f32 %v1339_v62, %v4137_v20  ;;  %v1232_v0 = vrot.slane %v1227_v38, 6  ;;  %v3200_v1 = vpop.f32.mrb[13].mxu1 }
 0x8ea   :  { %3577 = vtanh.f32 %v1341_v39  ;;  %v1234_v33 = vadd.f32 %v1232_v0, %v4133_v16  ;;  %v2948_v35 = vmul.f32 -1.442695, %v1341_v39 }
 0x8ec   :  { %3579 = vtanh.f32 %v1234_v33  ;;  %v2946_v2 = vmul.f32 -1.442695, %v1234_v33 }
 0x8ed   :  { %3581 = vpow2.f32 %v2948_v35 }
 0x8ee   :  { %3583 = vpow2.f32 %v2946_v2 }
 0x8f4   :  { %v3578_v31 = vpop.eup %3577 }
 0x8f5   :  { %1354 = vrot.lane.b32.xlu1 %v3578_v31, %s3746_s20 }
 0x8f6   :  { %v3580_v34 = vpop.eup %3579 }
 0x8f7   :  { %1247 = vrot.lane.b32.xlu0 %v3580_v34, %s3746_s20  ;;  %v3582_v3 = vpop.eup %3581 }
 0x8f8   :  { %v3584_v4 = vpop.eup %3583  ;;  %v1345_v7 = vadd.f32 1.0, %v3582_v3 }
 0x8f9   :  { %v1238_v8 = vadd.f32 1.0, %v3584_v4 }
 0x8fa   :  { %3585 = vrcp.f32 %v1345_v7 }
 0x8fb   :  { %3587 = vrcp.f32 %v1238_v8 }
 0x904   :  { %v3586_v9 = vpop.eup %3585 }
 0x905   :  { %v3588_v15 = vpop.eup %3587  ;;  %v1352_v22 = vmul.f32 %v3586_v9, %v1350_v21 }
 0x906   :  { %v1245_v26 = vmul.f32 %v3588_v15, %v1243_v23 }
 0x967   :  { %v1355_v10 = vpop.permute.xlu1 %1354 }
 0x968   :  { %v1357_v13 = vmul.f32 %v3586_v9, %v1355_v10 }
 0x969   :  { %v1248_v18 = vpop.permute.xlu0 %1247 }
 0x96a   :  { %1359 = vrot.lane.b32.xlu1 %v1357_v13, %s3747_s23  ;;  %v1250_v19 = vmul.f32 %v3588_v15, %v1248_v18 }
 0x96c   :  { %1252 = vrot.lane.b32.xlu0 %v1250_v19, %s3747_s23 }
 0x9dc   :  { %v1360_v24 = vpop.permute.xlu1 %1359 }
 0x9dd   :  { %v1362_v25 = vadd.f32 %v1360_v24, %v1352_v22 }
 0x9de   :  { %v1253_v27 = vpop.permute.xlu0 %1252 }
 0x9df   :  { %3589 = vtanh.f32 %v1362_v25  ;;  %v1255_v28 = vadd.f32 %v1253_v27, %v1245_v26  ;;  %v1564_v34 = vrot.slane %v1362_v25, 2 }
 0x9e1   :  { %3591 = vtanh.f32 %v1255_v28  ;;  %v1457_v2 = vrot.slane %v1255_v28, 6 }
 0x9e9   :  { %v3590_v29 = vpop.eup %3589 }
 0x9ea   :  { %1365 = vrot.lane.b32.xlu1 %v3590_v29, %s3741_s3 }
 0x9eb   :  { %v3592_v30 = vpop.eup %3591 }
 0x9ec   :  { %1258 = vrot.lane.b32.xlu0 %v3592_v30, %s3741_s3 }
 0xa5c   :  { %v1366_v32 = vpop.permute.xlu1 %1365 }
 0xa5d   :  { %v4175_v36 = vmul.f32 %v3586_v9, %v1366_v32 }
 0xa5e   :  { %v1259_v41 = vpop.permute.xlu0 %1258 }
 0xa5f   :  { %v1477_v37 = vrot.slane %v4175_v36, 4  ;;  %v4178_v42 = vmul.f32 %v3588_v15, %v1259_v41 }
 0xa61   :  { %1478 = vrot.lane.b32.xlu1 %v1477_v37, %s3748_s5  ;;  %v1370_v43 = vrot.slane %v4178_v42, 2  ;;  %v2710_v42 = vld [vmem:[%s4548_s24 + $0x20] sm:$0xff] }
 0xa63   :  { %1371 = vrot.lane.b32.xlu0 %v1370_v43, %s3748_s5 }
 0xad3   :  { %v1479_v44 = vpop.permute.xlu1 %1478 }
 0xad4   :  { %3220 = vmatmul.mubr.msk.f32.vlgmr.msra.gmra.mrb[12].mxu0 %vm103_vm0, %v1479_v44 }
 0xad5   :  { %3432 = vmatpush3.bf16.msra.mxu0 %v4101_v6  ;;  %3233 = vmatprep.mubr.msk.f32.mxu0 %vm3739_vm6, %v3738_v11  ;;  %v1372_v45 = vpop.permute.xlu0 %1371 }
 0xad6   :  { %3436 = vmatprep.subr.bf16.mxu0 %v3740_v14  ;;  %3213 = vmatmul.mubr.msk.f32.vlgmr.msra.gmra.mrb[14].mxu1 %vm103_vm0, %v1372_v45 }
 0xad7   :  { %3429 = vmatpush3.bf16.msra.mxu1 %v4099_v5  ;;  %3226 = vmatprep.mubr.msk.f32.mxu1 %vm3739_vm6, %v3738_v11 }
 0xad8   :  { %3433 = vmatprep.subr.bf16.mxu1 %v3740_v14 }
 0xba7   :  { %v1548_v47 = vpop.f32.mrb[12].mxu0 }
 0xba8   :  { %v1553_v48 = vrot.slane %v1548_v47, 6  ;;  %v3221_v49 = vpop.f32.mrb[13].mxu0 }
 0xba9   :  { %v1441_v51 = vpop.f32.mrb[14].mxu1 }
 0xbaa   :  { %v1555_v50 = vadd.f32 %v1553_v48, %v4137_v20  ;;  %v1446_v52 = vrot.slane %v1441_v51, 4  ;;  %v3214_v53 = vpop.f32.mrb[15].mxu1 }
 0xbac   :  { %3593 = vtanh.f32 %v1555_v50  ;;  %v1448_v54 = vadd.f32 %v1446_v52, %v4133_v16  ;;  %v2952_v57 = vmul.f32 -1.442695, %v1555_v50 }
 0xbae   :  { %3595 = vtanh.f32 %v1448_v54  ;;  %v2950_v58 = vmul.f32 -1.442695, %v1448_v54 }
 0xbaf   :  { %3597 = vpow2.f32 %v2952_v57 }
 0xbb0   :  { %3599 = vpow2.f32 %v2950_v58 }
 0xbb6   :  { %v3594_v55 = vpop.eup %3593 }
 0xbb7   :  { %1568 = vrot.lane.b32.xlu1 %v3594_v55, %s3746_s20 }
 0xbb8   :  { %v3596_v56 = vpop.eup %3595 }
 0xbb9   :  { %1461 = vrot.lane.b32.xlu0 %v3596_v56, %s3746_s20  ;;  %v3598_v59 = vpop.eup %3597 }
 0xbba   :  { %v3600_v61 = vpop.eup %3599  ;;  %v1559_v62 = vadd.f32 1.0, %v3598_v59 }
 0xbbb   :  { %v1452_v63 = vadd.f32 1.0, %v3600_v61 }
 0xbbc   :  { %3601 = vrcp.f32 %v1559_v62 }
 0xbbd   :  { %3603 = vrcp.f32 %v1452_v63 }
 0xbc6   :  { %v3602_v38 = vpop.eup %3601 }
 0xbc7   :  { %v3604_v1 = vpop.eup %3603  ;;  %v1566_v35 = vmul.f32 %v3602_v38, %v1564_v34 }
 0xbc8   :  { %v1459_v7 = vmul.f32 %v3604_v1, %v1457_v2 }
 0xc29   :  { %v1569_v39 = vpop.permute.xlu1 %1568 }
 0xc2a   :  { %v1571_v0 = vmul.f32 %v3602_v38, %v1569_v39 }
 0xc2b   :  { %v1462_v33 = vpop.permute.xlu0 %1461 }
 0xc2c   :  { %1573 = vrot.lane.b32.xlu1 %v1571_v0, %s3747_s23  ;;  %v1464_v31 = vmul.f32 %v3604_v1, %v1462_v33 }
 0xc2e   :  { %1466 = vrot.lane.b32.xlu0 %v1464_v31, %s3747_s23 }
 0xc9e   :  { %v1574_v3 = vpop.permute.xlu1 %1573 }
 0xc9f   :  { %v1576_v4 = vadd.f32 %v1574_v3, %v1566_v35 }
 0xca0   :  { %v1467_v8 = vpop.permute.xlu0 %1466 }
 0xca1   :  { %3605 = vtanh.f32 %v1576_v4  ;;  %v1469_v9 = vadd.f32 %v1467_v8, %v1459_v7  ;;  %v1775_v57 = vrot.slane %v1576_v4, 2 }
 0xca3   :  { %3607 = vtanh.f32 %v1469_v9  ;;  %v1671_v62 = vrot.slane %v1469_v9, 6 }
 0xcab   :  { %v3606_v10 = vpop.eup %3605 }
 0xcac   :  { %1579 = vrot.lane.b32.xlu1 %v3606_v10, %s3741_s3 }
 0xcad   :  { %v3608_v13 = vpop.eup %3607 }
 0xcae   :  { %1472 = vrot.lane.b32.xlu0 %v3608_v13, %s3741_s3 }
 0xd1e   :  { %v1580_v15 = vpop.permute.xlu1 %1579 }
 0xd1f   :  { %v4205_v18 = vmul.f32 %v3602_v38, %v1580_v15 }
 0xd20   :  { %v1473_v21 = vpop.permute.xlu0 %1472 }
 0xd21   :  { %v1691_v19 = vrot.slane %v4205_v18, 2  ;;  %v4208_v22 = vmul.f32 %v3604_v1, %v1473_v21  ;;  %v2714_v18 = vld [vmem:[%s4548_s24 + $0x40] sm:$0xff] }
 0xd23   :  { %1692 = vrot.lane.b32.xlu1 %v1691_v19, %s3748_s5  ;;  %v1584_v23 = vrot.slane %v4208_v22, 4  ;;  %v2712_v22 = vld [vmem:[%s4548_s24 + $0x30] sm:$0xff] }
 0xd25   :  { %1585 = vrot.lane.b32.xlu0 %v1584_v23, %s3748_s5 }
 0xd95   :  { %v1693_v24 = vpop.permute.xlu1 %1692 }
 0xd96   :  { %3234 = vmatmul.mubr.msk.f32.vlgmr.msra.gmra.mrb[14].mxu0 %vm103_vm0, %v1693_v24 }
 0xd97   :  { %3438 = vmatpush3.bf16.msra.mxu0 %v4101_v6  ;;  %3247 = vmatprep.mubr.msk.f32.mxu0 %vm3739_vm6, %v3738_v11  ;;  %v1586_v25 = vpop.permute.xlu0 %1585 }
 0xd98   :  { %3442 = vmatprep.subr.bf16.mxu0 %v3740_v14  ;;  %3227 = vmatmul.mubr.msk.f32.vlgmr.msra.gmra.mrb[16].mxu1 %vm103_vm0, %v1586_v25 }
 0xd99   :  { %3435 = vmatpush3.bf16.msra.mxu1 %v4099_v5  ;;  %3240 = vmatprep.mubr.msk.f32.mxu1 %vm3739_vm6, %v3738_v11 }
 0xd9a   :  { %3439 = vmatprep.subr.bf16.mxu1 %v3740_v14 }
 0xe69   :  { %v1762_v26 = vpop.f32.mrb[14].mxu0 }
 0xe6a   :  { %v1766_v27 = vadd.f32 %v1762_v26, %v4137_v20  ;;  %v3235_v28 = vpop.f32.mrb[15].mxu0 }
 0xe6b   :  { %v1655_v29 = vpop.f32.mrb[16].mxu1 }
 0xe6c   :  { %3609 = vtanh.f32 %v1766_v27  ;;  %v1660_v30 = vrot.slane %v1655_v29, 2  ;;  %v3228_v32 = vpop.f32.mrb[17].mxu1  ;;  %v2956_v47 = vmul.f32 -1.442695, %v1766_v27 }
 0xe6e   :  { %v1662_v41 = vadd.f32 %v1660_v30, %v4133_v16 }
 0xe70   :  { %3611 = vtanh.f32 %v1662_v41  ;;  %v2954_v48 = vmul.f32 -1.442695, %v1662_v41 }
 0xe71   :  { %3613 = vpow2.f32 %v2956_v47 }
 0xe72   :  { %3615 = vpow2.f32 %v2954_v48 }
 0xe76   :  { %v3610_v44 = vpop.eup %3609 }
 0xe77   :  { %1779 = vrot.lane.b32.xlu1 %v3610_v44, %s3746_s20 }
 0xe7a   :  { %v3612_v45 = vpop.eup %3611 }
 0xe7b   :  { %1675 = vrot.lane.b32.xlu0 %v3612_v45, %s3746_s20  ;;  %v3614_v49 = vpop.eup %3613 }
 0xe7c   :  { %v1770_v20 = vadd.f32 1.0, %v3614_v49  ;;  %v3616_v50 = vpop.eup %3615 }
 0xe7d   :  { %v1666_v51 = vadd.f32 1.0, %v3616_v50 }
 0xe7e   :  { %3617 = vrcp.f32 %v1770_v20 }
 0xe7f   :  { %3619 = vrcp.f32 %v1666_v51 }
 0xe88   :  { %v3618_v52 = vpop.eup %3617 }
 0xe89   :  { %v3620_v54 = vpop.eup %3619  ;;  %v1777_v58 = vmul.f32 %v3618_v52, %v1775_v57 }
 0xe8a   :  { %v1673_v63 = vmul.f32 %v3620_v54, %v1671_v62 }
 0xee9   :  { %v1780_v53 = vpop.permute.xlu1 %1779 }
 0xeea   :  { %v1782_v16 = vmul.f32 %v3618_v52, %v1780_v53 }
 0xeec   :  { %1784 = vrot.lane.b32.xlu1 %v1782_v16, %s3747_s23 }
 0xeed   :  { %v1676_v55 = vpop.permute.xlu0 %1675 }
 0xeee   :  { %v1678_v56 = vmul.f32 %v3620_v54, %v1676_v55 }
 0xef0   :  { %1680 = vrot.lane.b32.xlu0 %v1678_v56, %s3747_s23 }
 0xf5e   :  { %v1785_v59 = vpop.permute.xlu1 %1784 }
 0xf5f   :  { %v1787_v61 = vadd.f32 %v1785_v59, %v1777_v58 }
 0xf61   :  { %3621 = vtanh.f32 %v1787_v61  ;;  %v1985_v20 = vrot.slane %v1787_v61, 2 }
 0xf62   :  { %v1681_v38 = vpop.permute.xlu0 %1680 }
 0xf63   :  { %v1683_v39 = vadd.f32 %v1681_v38, %v1673_v63 }
 0xf65   :  { %3623 = vtanh.f32 %v1683_v39  ;;  %v1879_v53 = vrot.slane %v1683_v39, 6 }
 0xf6b   :  { %v3622_v0 = vpop.eup %3621 }
 0xf6c   :  { %1790 = vrot.lane.b32.xlu1 %v3622_v0, %s3741_s3 }
 0xf6f   :  { %v3624_v1 = vpop.eup %3623 }
 0xf70   :  { %1686 = vrot.lane.b32.xlu0 %v3624_v1, %s3741_s3 }
 0xfde   :  { %v1791_v33 = vpop.permute.xlu1 %1790 }
 0xfdf   :  { %v4235_v31 = vmul.f32 %v3618_v52, %v1791_v33 }
 0xfe1   :  { %1899 = vrot.lane.b32.xlu1 %v4235_v31, %s3748_s5 }
 0xfe2   :  { %v1687_v34 = vpop.permute.xlu0 %1686 }
 0xfe3   :  { %v4239_v35 = vmul.f32 %v3620_v54, %v1687_v34 }
 0xfe5   :  { %v1795_v2 = vrot.slane %v4239_v35, 6 }
 0xfe7   :  { %1796 = vrot.lane.b32.xlu0 %v1795_v2, %s3748_s5 }
0x1053   :  { %v1900_v3 = vpop.permute.xlu1 %1899 }
0x1054   :  { %3248 = vmatmul.mubr.msk.f32.vlgmr.msra.gmra.mrb[16].mxu0 %vm103_vm0, %v1900_v3 }
0x1055   :  { %3444 = vmatpush3.bf16.msra.mxu0 %v4101_v6  ;;  %3261 = vmatprep.mubr.msk.f32.mxu0 %vm3739_vm6, %v3738_v11 }
0x1056   :  { %3448 = vmatprep.subr.bf16.mxu0 %v3740_v14 }
0x1059   :  { %v1797_v4 = vpop.permute.xlu0 %1796 }
0x105a   :  { %3241 = vmatmul.mubr.msk.f32.vlgmr.msra.gmra.mrb[18].mxu1 %vm103_vm0, %v1797_v4 }
0x105b   :  { %3441 = vmatpush3.bf16.msra.mxu1 %v4099_v5  ;;  %3254 = vmatprep.mubr.msk.f32.mxu1 %vm3739_vm6, %v3738_v11 }
0x105c   :  { %3445 = vmatprep.subr.bf16.mxu1 %v3740_v14 }
0x1127   :  { %v1969_v7 = vpop.f32.mrb[16].mxu0 }
0x1128   :  { %v1974_v8 = vrot.slane %v1969_v7, 2  ;;  %v3249_v9 = vpop.f32.mrb[17].mxu0 }
0x112a   :  { %v1976_v10 = vadd.f32 %v1974_v8, %v4135_v17 }
0x112c   :  { %3625 = vtanh.f32 %v1976_v10  ;;  %v2960_v26 = vmul.f32 -1.442695, %v1976_v10 }
0x112d   :  { %v1866_v13 = vpop.f32.mrb[18].mxu1 }
0x112e   :  { %v1870_v15 = vadd.f32 %v1866_v13, %v4131_v12  ;;  %v3242_v21 = vpop.f32.mrb[19].mxu1 }
0x1130   :  { %3627 = vtanh.f32 %v1870_v15  ;;  %v2958_v27 = vmul.f32 -1.442695, %v1870_v15 }
0x1131   :  { %3629 = vpow2.f32 %v2960_v26 }
0x1132   :  { %3631 = vpow2.f32 %v2958_v27 }
0x1136   :  { %v3626_v24 = vpop.eup %3625 }
0x1137   :  { %1989 = vrot.lane.b32.xlu1 %v3626_v24, %s3746_s20 }
0x113a   :  { %v3628_v25 = vpop.eup %3627 }
0x113b   :  { %1883 = vrot.lane.b32.xlu0 %v3628_v25, %s3746_s20  ;;  %v3630_v28 = vpop.eup %3629 }
0x113c   :  { %v1980_v29 = vadd.f32 1.0, %v3630_v28  ;;  %v3632_v30 = vpop.eup %3631 }
0x113d   :  { %v1874_v32 = vadd.f32 1.0, %v3632_v30 }
0x113e   :  { %3633 = vrcp.f32 %v1980_v29 }
0x113f   :  { %3635 = vrcp.f32 %v1874_v32 }
0x1148   :  { %v3634_v41 = vpop.eup %3633 }
0x1149   :  { %v3636_v47 = vpop.eup %3635  ;;  %v1987_v50 = vmul.f32 %v3634_v41, %v1985_v20 }
0x114a   :  { %v1881_v16 = vmul.f32 %v3636_v47, %v1879_v53 }
0x11a9   :  { %v1990_v44 = vpop.permute.xlu1 %1989 }
0x11aa   :  { %v1992_v45 = vmul.f32 %v3634_v41, %v1990_v44 }
0x11ac   :  { %1994 = vrot.lane.b32.xlu1 %v1992_v45, %s3747_s23 }
0x11ad   :  { %v1884_v48 = vpop.permute.xlu0 %1883 }
0x11ae   :  { %v1886_v49 = vmul.f32 %v3636_v47, %v1884_v48 }
0x11b0   :  { %1888 = vrot.lane.b32.xlu0 %v1886_v49, %s3747_s23 }
0x121e   :  { %v1995_v51 = vpop.permute.xlu1 %1994 }
0x121f   :  { %v1997_v52 = vadd.f32 %v1995_v51, %v1987_v50 }
0x1221   :  { %3637 = vtanh.f32 %v1997_v52  ;;  %v2198_v44 = vrot.slane %v1997_v52, 2 }
0x1222   :  { %v1889_v54 = vpop.permute.xlu0 %1888 }
0x1223   :  { %v1891_v55 = vadd.f32 %v1889_v54, %v1881_v16 }
0x1225   :  { %3639 = vtanh.f32 %v1891_v55 }
0x122b   :  { %v3638_v56 = vpop.eup %3637 }
0x122c   :  { %2000 = vrot.lane.b32.xlu1 %v3638_v56, %s3741_s3 }
0x122f   :  { %v3640_v57 = vpop.eup %3639 }
0x1230   :  { %1894 = vrot.lane.b32.xlu0 %v3640_v57, %s3741_s3 }
0x129e   :  { %v2001_v58 = vpop.permute.xlu1 %2000 }
0x129f   :  { %v4263_v59 = vmul.f32 %v3634_v41, %v2001_v58 }
0x12a1   :  { %v2111_v61 = vrot.slane %v4263_v59, 6 }
0x12a2   :  { %v1895_v62 = vpop.permute.xlu0 %1894 }
0x12a3   :  { %2112 = vrot.lane.b32.xlu1 %v2111_v61, %s3748_s5  ;;  %v4269_v63 = vmul.f32 %v3636_v47, %v1895_v62  ;;  %v2091_v47 = vrot.slane %v1891_v55, 6 }
0x12a5   :  { %2005 = vrot.lane.b32.xlu0 %v4269_v63, %s3748_s5 }
0x1315   :  { %v2113_v38 = vpop.permute.xlu1 %2112 }
0x1316   :  { %3262 = vmatmul.mubr.msk.f32.vlgmr.msra.gmra.mrb[18].mxu0 %vm103_vm0, %v2113_v38 }
0x1317   :  { %3450 = vmatpush3.bf16.msra.mxu0 %v4101_v6  ;;  %3275 = vmatprep.mubr.msk.f32.mxu0 %vm3739_vm6, %v3738_v11  ;;  %v2006_v39 = vpop.permute.xlu0 %2005 }
0x1318   :  { %3454 = vmatprep.subr.bf16.mxu0 %v3740_v14  ;;  %3255 = vmatmul.mubr.msk.f32.vlgmr.msra.gmra.mrb[20].mxu1 %vm103_vm0, %v2006_v39 }
0x1319   :  { %3447 = vmatpush3.bf16.msra.mxu1 %v4099_v5  ;;  %3268 = vmatprep.mubr.msk.f32.mxu1 %vm3739_vm6, %v3738_v11 }
0x131a   :  { %3451 = vmatprep.subr.bf16.mxu1 %v3740_v14 }
0x13e9   :  { %v2182_v0 = vpop.f32.mrb[18].mxu0 }
0x13ea   :  { %v2187_v1 = vrot.slane %v2182_v0, 4  ;;  %v3263_v33 = vpop.f32.mrb[19].mxu0 }
0x13eb   :  { %v2075_v3 = vpop.f32.mrb[20].mxu1 }
0x13ec   :  { %v2189_v34 = vadd.f32 %v2187_v1, %v4135_v17  ;;  %v2080_v4 = vrot.slane %v2075_v3, 6  ;;  %v3256_v7 = vpop.f32.mrb[21].mxu1 }
0x13ee   :  { %3641 = vtanh.f32 %v2189_v34  ;;  %v2082_v8 = vadd.f32 %v2080_v4, %v4131_v12  ;;  %v2964_v13 = vmul.f32 -1.442695, %v2189_v34 }
0x13f0   :  { %3643 = vtanh.f32 %v2082_v8  ;;  %v2962_v15 = vmul.f32 -1.442695, %v2082_v8 }
0x13f1   :  { %3645 = vpow2.f32 %v2964_v13 }
0x13f2   :  { %3647 = vpow2.f32 %v2962_v15 }
0x13f8   :  { %v3642_v9 = vpop.eup %3641 }
0x13f9   :  { %2202 = vrot.lane.b32.xlu1 %v3642_v9, %s3746_s20 }
0x13fa   :  { %v3644_v10 = vpop.eup %3643 }
0x13fb   :  { %2095 = vrot.lane.b32.xlu0 %v3644_v10, %s3746_s20  ;;  %v3646_v21 = vpop.eup %3645 }
0x13fc   :  { %v3648_v24 = vpop.eup %3647  ;;  %v2193_v25 = vadd.f32 1.0, %v3646_v21 }
0x13fd   :  { %v2086_v26 = vadd.f32 1.0, %v3648_v24 }
0x13fe   :  { %3649 = vrcp.f32 %v2193_v25 }
0x13ff   :  { %3651 = vrcp.f32 %v2086_v26 }
0x1408   :  { %v3650_v27 = vpop.eup %3649 }
0x1409   :  { %v3652_v30 = vpop.eup %3651  ;;  %v2200_v45 = vmul.f32 %v3650_v27, %v2198_v44 }
0x140a   :  { %v2093_v20 = vmul.f32 %v3652_v30, %v2091_v47 }
0x146b   :  { %v2203_v28 = vpop.permute.xlu1 %2202 }
0x146c   :  { %v2205_v29 = vmul.f32 %v3650_v27, %v2203_v28 }
0x146d   :  { %v2096_v32 = vpop.permute.xlu0 %2095 }
0x146e   :  { %2207 = vrot.lane.b32.xlu1 %v2205_v29, %s3747_s23  ;;  %v2098_v41 = vmul.f32 %v3652_v30, %v2096_v32 }
0x1470   :  { %2100 = vrot.lane.b32.xlu0 %v2098_v41, %s3747_s23 }
0x14e0   :  { %v2208_v48 = vpop.permute.xlu1 %2207 }
0x14e1   :  { %v2210_v49 = vadd.f32 %v2208_v48, %v2200_v45 }
0x14e2   :  { %v2101_v50 = vpop.permute.xlu0 %2100 }
0x14e3   :  { %3653 = vtanh.f32 %v2210_v49  ;;  %v2103_v51 = vadd.f32 %v2101_v50, %v2093_v20 }
0x14e5   :  { %3655 = vtanh.f32 %v2103_v51  ;;  %v2305_v41 = vrot.slane %v2103_v51, 6 }
0x14ed   :  { %v3654_v53 = vpop.eup %3653 }
0x14ee   :  { %2213 = vrot.lane.b32.xlu1 %v3654_v53, %s3741_s3 }
0x14ef   :  { %v3656_v16 = vpop.eup %3655 }
0x14f0   :  { %2106 = vrot.lane.b32.xlu0 %v3656_v16, %s3741_s3 }
0x1560   :  { %v2214_v54 = vpop.permute.xlu1 %2213 }
0x1561   :  { %v4291_v56 = vmul.f32 %v3650_v27, %v2214_v54 }
0x1562   :  { %v2107_v57 = vpop.permute.xlu0 %2106 }
0x1563   :  { %v2325_v52 = vrot.slane %v4291_v56, 4  ;;  %v4294_v55 = vmul.f32 %v3652_v30, %v2107_v57  ;;  %v2412_v30 = vrot.slane %v2210_v49, 2 }
0x1565   :  { %2326 = vrot.lane.b32.xlu1 %v2325_v52, %s3748_s5  ;;  %v2218_v58 = vrot.slane %v4294_v55, 2 }
0x1567   :  { %2219 = vrot.lane.b32.xlu0 %v2218_v58, %s3748_s5  ;;  %v3541_v56 = vpack.i.bf16 %v1691_v19, %v2218_v58  ;;  %v2715_v19 = vld [vmem:[%s4548_s24 + $0x48] sm:$0xff] }
0x1568   :  { %v3494_v58 = vpack.c.bf16 %v2715_v19, %v2714_v18 }
0x15d7   :  { %v2327_v62 = vpop.permute.xlu1 %2326 }
0x15d8   :  { %3276 = vmatmul.mubr.msk.f32.vlgmr.msra.gmra.mrb[20].mxu0 %vm103_vm0, %v2327_v62 }
0x15d9   :  { %3456 = vmatpush3.bf16.msra.mxu0 %v4101_v6  ;;  %3289 = vmatprep.mubr.msk.f32.mxu0 %vm3739_vm6, %v3738_v11  ;;  %v2220_v38 = vpop.permute.xlu0 %2219 }
0x15da   :  { %3481 = vmatprep.subr.bf16.mxu0 %v3740_v14  ;;  %3269 = vmatmul.mubr.msk.f32.vlgmr.msra.gmra.mrb[22].mxu1 %vm103_vm0, %v2220_v38 }
0x15db   :  { %3453 = vmatpush3.bf16.msra.mxu1 %v4099_v5  ;;  %3282 = vmatprep.mubr.msk.f32.mxu1 %vm3739_vm6, %v3738_v11 }
0x15dc   :  { %3457 = vmatprep.subr.bf16.mxu1 %v3740_v14 }
0x16ab   :  { %v2396_v39 = vpop.f32.mrb[20].mxu0 }
0x16ac   :  { %v2401_v0 = vrot.slane %v2396_v39, 6  ;;  %v3277_v1 = vpop.f32.mrb[21].mxu0 }
0x16ad   :  { %v2289_v33 = vpop.f32.mrb[22].mxu1 }
0x16ae   :  { %v2403_v6 = vadd.f32 %v2401_v0, %v4135_v17  ;;  %v2294_v34 = vrot.slane %v2289_v33, 4  ;;  %v3270_v3 = vpop.f32.mrb[23].mxu1 }
0x16b0   :  { %3657 = vtanh.f32 %v2403_v6  ;;  %v2296_v4 = vadd.f32 %v2294_v34, %v4131_v12  ;;  %v2968_v8 = vmul.f32 -1.442695, %v2403_v6 }
0x16b2   :  { %3659 = vtanh.f32 %v2296_v4  ;;  %v2966_v9 = vmul.f32 -1.442695, %v2296_v4 }
0x16b3   :  { %3661 = vpow2.f32 %v2968_v8 }
0x16b4   :  { %3663 = vpow2.f32 %v2966_v9 }
0x16ba   :  { %v3658_v7 = vpop.eup %3657 }
0x16bb   :  { %2416 = vrot.lane.b32.xlu1 %v3658_v7, %s3746_s20 }
0x16bc   :  { %v3660_v5 = vpop.eup %3659 }
0x16bd   :  { %2309 = vrot.lane.b32.xlu0 %v3660_v5, %s3746_s20  ;;  %v3662_v10 = vpop.eup %3661 }
0x16be   :  { %v3664_v13 = vpop.eup %3663  ;;  %v2407_v15 = vadd.f32 1.0, %v3662_v10 }
0x16bf   :  { %v2300_v21 = vadd.f32 1.0, %v3664_v13 }
0x16c0   :  { %3665 = vrcp.f32 %v2407_v15 }
0x16c1   :  { %3667 = vrcp.f32 %v2300_v21 }
0x16ca   :  { %v3666_v24 = vpop.eup %3665 }
0x16cb   :  { %v3668_v27 = vpop.eup %3667  ;;  %v2414_v32 = vmul.f32 %v3666_v24, %v2412_v30 }
0x16cc   :  { %v2307_v47 = vmul.f32 %v3668_v27, %v2305_v41 }
0x172d   :  { %v2417_v25 = vpop.permute.xlu1 %2416 }
0x172e   :  { %v2419_v26 = vmul.f32 %v3666_v24, %v2417_v25 }
0x172f   :  { %v2310_v28 = vpop.permute.xlu0 %2309 }
0x1730   :  { %2421 = vrot.lane.b32.xlu1 %v2419_v26, %s3747_s23  ;;  %v2312_v29 = vmul.f32 %v3668_v27, %v2310_v28 }
0x1732   :  { %2314 = vrot.lane.b32.xlu0 %v2312_v29, %s3747_s23 }
0x17a2   :  { %v2422_v44 = vpop.permute.xlu1 %2421 }
0x17a3   :  { %v2424_v45 = vadd.f32 %v2422_v44, %v2414_v32 }
0x17a4   :  { %v2315_v48 = vpop.permute.xlu0 %2314 }
0x17a5   :  { %3669 = vtanh.f32 %v2424_v45  ;;  %v2317_v20 = vadd.f32 %v2315_v48, %v2307_v47 }
0x17a7   :  { %3671 = vtanh.f32 %v2317_v20  ;;  %v2519_v32 = vrot.slane %v2317_v20, 6 }
0x17af   :  { %v3670_v50 = vpop.eup %3669 }
0x17b0   :  { %2427 = vrot.lane.b32.xlu1 %v3670_v50, %s3741_s3  ;;  %v2722_v50 = vld [vmem:[%s4549_s25] sm:$0xff] }
0x17b1   :  { %v3672_v53 = vpop.eup %3671 }
0x17b2   :  { %2320 = vrot.lane.b32.xlu0 %v3672_v53, %s3741_s3  ;;  %v2706_v53 = vld [vmem:[%s4548_s24] sm:$0xff] }
0x1822   :  { %v2428_v16 = vpop.permute.xlu1 %2427 }
0x1823   :  { %v4321_v54 = vmul.f32 %v3666_v24, %v2428_v16  ;;  %v2707_v16 = vld [vmem:[%s4548_s24 + $0x8] sm:$0xff] }
0x1824   :  { %v2321_v57 = vpop.permute.xlu0 %2320 }
0x1825   :  { %v2539_v49 = vrot.slane %v4321_v54, 2  ;;  %v4324_v51 = vmul.f32 %v3668_v27, %v2321_v57  ;;  %v2623_v27 = vrot.slane %v2424_v45, 2  ;;  %v2723_v45 = vld [vmem:[%s4549_s25 + $0x8] sm:$0xff]  ;;  %v2724_v57 = vld [vmem:[%s4549_s25 + $0x10] sm:$0xff]  ;;  %v3531_v54 = vpack.i.bf16 %v2325_v52, %v1584_v23  ;;  %v2713_v23 = vld [vmem:[%s4548_s24 + $0x38] sm:$0xff] }
0x1826   :  { %v3458_v20 = vpack.c.bf16 %v2723_v45, %v2722_v50  ;;  %v2720_v50 = vld [vmem:[%s4548_s24 + $0x70] sm:$0xff] }
0x1827   :  { %2540 = vrot.lane.b32.xlu1 %v2539_v49, %s3748_s5  ;;  %v2432_v62 = vrot.slane %v4324_v51, 4 }
0x1829   :  { %2433 = vrot.lane.b32.xlu0 %v2432_v62, %s3748_s5 }
0x1899   :  { %v2541_v38 = vpop.permute.xlu1 %2540 }
0x189a   :  { %3290 = vmatmul.mubr.msk.f32.vlgmr.msra.gmra.mrb[22].mxu0 %vm103_vm0, %v2541_v38  ;;  %v2725_v38 = vld [vmem:[%s4549_s25 + $0x18] sm:$0xff] }
0x189b   :  { %3359 = vmatprep.mubr.msk.f32.mxu0 %vm3739_vm6, %v3738_v11  ;;  %v2434_v39 = vpop.permute.xlu0 %2433 }
0x189c   :  { %3283 = vmatmul.mubr.msk.f32.vlgmr.msra.gmra.mrb[24].mxu1 %vm103_vm0, %v2434_v39  ;;  %v3482_v39 = vpack.c.bf16 %v2707_v16, %v2706_v53  ;;  %v2721_v53 = vld [vmem:[%s4548_s24 + $0x78] sm:$0xff] }
0x189d   :  { %3324 = vmatprep.mubr.msk.f32.mxu1 %vm3739_vm6, %v3738_v11  ;;  %3459 = vmatpush3.bf16.msra.mxu1 %v3458_v20  ;;  %v3503_v20 = vpack.c.bf16 %v2721_v53, %v2720_v50 }
0x189e   :  { %3483 = vmatpush3.bf16.msra.mxu0 %v3482_v39  ;;  %3460 = vmatprep.subr.bf16.mxu1 %v3740_v14 }
0x189f   :  { %3484 = vmatprep.subr.bf16.mxu0 %v3740_v14 }
0x196d   :  { %v2610_v0 = vpop.f32.mrb[22].mxu0 }
0x196e   :  { %v2614_v1 = vadd.f32 %v2610_v0, %v4135_v17  ;;  %v3291_v6 = vpop.f32.mrb[23].mxu0  ;;  %v2708_v0 = vld [vmem:[%s4548_s24 + $0x10] sm:$0xff] }
0x196f   :  { %v2503_v33 = vpop.f32.mrb[24].mxu1  ;;  %v3526_v6 = vpack.i.bf16 %v2539_v49, %v1370_v43  ;;  %v2711_v43 = vld [vmem:[%s4548_s24 + $0x28] sm:$0xff] }
0x1970   :  { %3673 = vtanh.f32 %v2614_v1  ;;  %v2508_v34 = vrot.slane %v2503_v33, 2  ;;  %v3284_v3 = vpop.f32.mrb[25].mxu1  ;;  %v2972_v8 = vmul.f32 -1.442695, %v2614_v1  ;;  %v2709_v1 = vld [vmem:[%s4548_s24 + $0x18] sm:$0xff]  ;;  %v3461_v33 = vpack.c.bf16 %v2725_v38, %v2724_v57 }
0x1971   :  { %v2726_v3 = vld [vmem:[%s4549_s25 + $0x20] sm:$0xff]  ;;  %v3536_v38 = vpack.i.bf16 %v4235_v31, %v4269_v63 }
0x1972   :  { %v2510_v4 = vadd.f32 %v2508_v34, %v4131_v12  ;;  %v3485_v34 = vpack.c.bf16 %v2709_v1, %v2708_v0  ;;  %3462 = vmatpush3.bf16.msra.mxu1 %v3461_v33  ;;  %v3546_v1 = vpack.i.bf16 %v1477_v37, %v2432_v62 }
0x1973   :  { %3463 = vmatprep.subr.bf16.mxu1 %v3740_v14 }
0x1974   :  { %3675 = vtanh.f32 %v2510_v4  ;;  %v2970_v11 = vmul.f32 -1.442695, %v2510_v4  ;;  %v2727_v4 = vld [vmem:[%s4549_s25 + $0x28] sm:$0xff]  ;;  %3486 = vmatpush3.bf16.msra.mxu0 %v3485_v34 }
0x1975   :  { %3677 = vpow2.f32 %v2972_v8  ;;  %v3464_v49 = vpack.c.bf16 %v2727_v4, %v2726_v3  ;;  %v2728_v8 = vld [vmem:[%s4549_s25 + $0x30] sm:$0xff]  ;;  %3487 = vmatprep.subr.bf16.mxu0 %v3740_v14 }
0x1976   :  { %3679 = vpow2.f32 %v2970_v11  ;;  %v2729_v11 = vld [vmem:[%s4549_s25 + $0x38] sm:$0xff] }
0x1977   :  { %3465 = vmatpush3.bf16.msra.mxu1 %v3464_v49  ;;  %v3467_v52 = vpack.c.bf16 %v2729_v11, %v2728_v8 }
0x1978   :  { %3466 = vmatprep.subr.bf16.mxu1 %v3740_v14 }
0x197a   :  { %v3674_v7 = vpop.eup %3673 }
0x197b   :  { %2627 = vrot.lane.b32.xlu1 %v3674_v7, %s3746_s20  ;;  %3468 = vmatpush3.bf16.msra.mxu1 %v3467_v52 }
0x197c   :  { %3469 = vmatprep.subr.bf16.mxu1 %v3740_v14 }
0x197e   :  { %v3676_v5 = vpop.eup %3675 }
0x197f   :  { %2523 = vrot.lane.b32.xlu0 %v3676_v5, %s3746_s20  ;;  %v3678_v9 = vpop.eup %3677  ;;  %v3488_v5 = vpack.c.bf16 %v2711_v43, %v2710_v42 }
0x1980   :  { %v2618_v17 = vadd.f32 1.0, %v3678_v9  ;;  %v3680_v10 = vpop.eup %3679  ;;  %v3491_v9 = vpack.c.bf16 %v2713_v23, %v2712_v22 }
0x1981   :  { %v2514_v13 = vadd.f32 1.0, %v3680_v10  ;;  %3489 = vmatpush3.bf16.msra.mxu0 %v3488_v5  ;;  %v2731_v10 = vld [vmem:[%s4549_s25 + $0x48] sm:$0xff] }
0x1982   :  { %3681 = vrcp.f32 %v2618_v17  ;;  %v2730_v17 = vld [vmem:[%s4549_s25 + $0x40] sm:$0xff]  ;;  %3490 = vmatprep.subr.bf16.mxu0 %v3740_v14 }
0x1983   :  { %3683 = vrcp.f32 %v2514_v13  ;;  %v3470_v55 = vpack.c.bf16 %v2731_v10, %v2730_v17  ;;  %v2732_v13 = vld [vmem:[%s4549_s25 + $0x50] sm:$0xff] }
0x1985   :  { %3492 = vmatpush3.bf16.msra.mxu0 %v3491_v9  ;;  %3471 = vmatpush3.bf16.msra.mxu1 %v3470_v55 }
0x1986   :  { %3493 = vmatprep.subr.bf16.mxu0 %v3740_v14  ;;  %3472 = vmatprep.subr.bf16.mxu1 %v3740_v14 }
0x1989   :  { %3495 = vmatpush3.bf16.msra.mxu0 %v3494_v58 }
0x198a   :  { %3496 = vmatprep.subr.bf16.mxu0 %v3740_v14 }
0x198c   :  { %v4343_v15 = vpop.eup %3681 }
0x198d   :  { %v4347_v24 = vpop.eup %3683  ;;  %v2625_v28 = vmul.f32 %v4343_v15, %v2623_v27 }
0x198e   :  { %v2521_v41 = vmul.f32 %v4347_v24, %v2519_v32 }
0x19ed   :  { %v2628_v12 = vpop.permute.xlu1 %2627 }
0x19ee   :  { %v2630_v21 = vmul.f32 %v4343_v15, %v2628_v12  ;;  %v2733_v12 = vld [vmem:[%s4549_s25 + $0x58] sm:$0xff] }
0x19f0   :  { %2632 = vrot.lane.b32.xlu1 %v2630_v21, %s3747_s23  ;;  %v2716_v21 = vld [vmem:[%s4548_s24 + $0x50] sm:$0xff] }
0x19f1   :  { %v2524_v25 = vpop.permute.xlu0 %2523 }
0x19f2   :  { %v2526_v26 = vmul.f32 %v4347_v24, %v2524_v25  ;;  %v3473_v25 = vpack.c.bf16 %v2733_v12, %v2732_v13 }
0x19f4   :  { %2528 = vrot.lane.b32.xlu0 %v2526_v26, %s3747_s23  ;;  %v2717_v26 = vld [vmem:[%s4548_s24 + $0x58] sm:$0xff]  ;;  %3474 = vmatpush3.bf16.msra.mxu1 %v3473_v25 }
0x19f5   :  { %v3497_v27 = vpack.c.bf16 %v2717_v26, %v2716_v21  ;;  %3475 = vmatprep.subr.bf16.mxu1 %v3740_v14 }
0x19f7   :  { %3498 = vmatpush3.bf16.msra.mxu0 %v3497_v27 }
0x19f8   :  { %3499 = vmatprep.subr.bf16.mxu0 %v3740_v14 }
0x1a62   :  { %v2633_v29 = vpop.permute.xlu1 %2632 }
0x1a63   :  { %v2635_v30 = vadd.f32 %v2633_v29, %v2625_v28  ;;  %v2734_v28 = vld [vmem:[%s4549_s25 + $0x60] sm:$0xff]  ;;  %v2735_v29 = vld [vmem:[%s4549_s25 + $0x68] sm:$0xff] }
0x1a64   :  { %v3476_v32 = vpack.c.bf16 %v2735_v29, %v2734_v28 }
0x1a65   :  { %3685 = vtanh.f32 %v2635_v30  ;;  %v2718_v30 = vld [vmem:[%s4548_s24 + $0x60] sm:$0xff] }
0x1a66   :  { %v2529_v44 = vpop.permute.xlu0 %2528  ;;  %3477 = vmatpush3.bf16.msra.mxu1 %v3476_v32 }
0x1a67   :  { %v2531_v47 = vadd.f32 %v2529_v44, %v2521_v41  ;;  %v2719_v41 = vld [vmem:[%s4548_s24 + $0x68] sm:$0xff]  ;;  %3478 = vmatprep.subr.bf16.mxu1 %v3740_v14  ;;  %s3750_s24 = smov 48  }
0x1a68   :  { %v3500_v44 = vpack.c.bf16 %v2719_v41, %v2718_v30 }
0x1a69   :  { %3687 = vtanh.f32 %v2531_v47  ;;  %v2736_v47 = vld [vmem:[%s4549_s25 + $0x70] sm:$0xff] }
0x1a6a   :  { %3501 = vmatpush3.bf16.msra.mxu0 %v3500_v44 }
0x1a6b   :  { %3502 = vmatprep.subr.bf16.mxu0 %v3740_v14 }
0x1a6e   :  { %3504 = vmatpush3.bf16.msra.mxu0 %v3503_v20 }
0x1a6f   :  { %v3686_v48 = vpop.eup %3685 }
0x1a70   :  { %2638 = vrot.lane.b32.xlu1 %v3686_v48, %s3741_s3  ;;  %v2737_v48 = vld [vmem:[%s4549_s25 + $0x78] sm:$0xff]  ;;  %s3751_s25 = smov 64  }
0x1a71   :  { %v3479_v45 = vpack.c.bf16 %v2737_v48, %v2736_v47 }
0x1a73   :  { %v3688_v7 = vpop.eup %3687  ;;  %3480 = vmatpush3.bf16.msra.mxu1 %v3479_v45 }
0x1a74   :  { %3527 = vrot.lane.b32.xlu1 %v3526_v6, %s3746_s20  ;;  %2534 = vrot.lane.b32.xlu0 %v3688_v7, %s3741_s3  ;;  %v2973_v6 = vld [vmem:[#allocation2] ss:$0 sm:$0xff] }
0x1a78   :  { %3532 = vrot.lane.b32.xlu1 %v3531_v54, %s3749_s10 }
0x1a7c   :  { %3542 = vrot.lane.b32.xlu1 %v3541_v56, %s3741_s3 }
0x1ae2   :  { %v2639_v16 = vpop.permute.xlu1 %2638 }
0x1ae3   :  { %v2641_v57 = vmul.f32 %v4343_v15, %v2639_v16 }
0x1ae5   :  { %2677 = vrot.lane.b32.xlu0 %v2641_v57, %s3748_s5 }
0x1ae6   :  { %v2535_v39 = vpop.permute.xlu0 %2534  ;;  %v3528_v31 = vpop.permute.xlu1 %3527 }
0x1ae7   :  { %v2537_v0 = vmul.f32 %v4347_v24, %v2535_v39  ;;  %v3529_v24 = vunpack.i.l.bf16 %v3528_v31  ;;  %v3530_v33 = vunpack.i.h.bf16 %v3528_v31 }
0x1ae9   :  { %3537 = vrot.lane.b32.xlu0 %v3536_v38, %s3747_s23  ;;  %v2660_v14 = vrot.slane %v2537_v0, 6  ;;  %v2664_v36 = vsel %vm103_vm0, %v4155_v60, %v3529_v24  ;;  %s3752_s23 = smov [#allocation5]  }
0x1aea   :  { %v3533_v63 = vpop.permute.xlu1 %3532  ;;  %s2907_s5 = sshll.u32 %s3752_s23, 4  ;;  %s2908_s5 = int_to_ptr.vmem [resolvable:$true] %s2907_s5 }
0x1aeb   :  { %v3551_v15 = vpack.i.bf16 %v1263_v46, %v2660_v14  ;;  %v3534_v34 = vunpack.i.l.bf16 %v3533_v63  ;;  %v3535_v4 = vunpack.i.h.bf16 %v3533_v63  ;;  %s3689_s12 = scalar_lea.vmem %s2908_s5, 32  ;;  %p3694_p1 = scmp.lt.s32.totalorder %s2908_s5, %s2908_s5 }
0x1aec   :  { %p3690_p0 = scmp.ne.s32.totalorder %s2908_s5, %s3689_s12  ;;  %p3695_p2 = scmp.lt.s32.totalorder %s3689_s12, %s3689_s12 }
0x1aed   :  { %3547 = vrot.lane.b32.xlu0 %v3546_v1, %s3750_s24  ;;  %3552 = vrot.lane.b32.xlu1 %v3551_v15, %s3751_s25  ;;  %v2665_v40 = vsel %vm298_vm8, %v2664_v36, %v3534_v34 }
0x1aee   :  { %v3543_v62 = vpop.permute.xlu1 %3542  ;;  %v2667_v54 = vsel %vm2666_vm13, %v2665_v40, %v1795_v2  ;;  %p3696_p3 = por %p3695_p2, %p3694_p1 }
0x1aef   :  { %v3545_v60 = vunpack.i.h.bf16 %v3543_v62  ;;  %v3544_v8 = vunpack.i.l.bf16 %v3543_v62 }
0x1af0   :  { %p3697_p4 = pnand %p3696_p3, %p3690_p0 }
0x1af1   :  { %2885 = vperm.xlu0 %3556, %v2973_v6  }
0x1b57   :  { %v2678_v3 = vpop.permute.xlu0 %2677 }
0x1b58   :  { %v2699_v51 = vsel %vm103_vm0, %v2678_v3, %v3530_v33  ;;  %vm2672_vm0 = vcmask 785408  }
0x1b59   :  { %v2700_v46 = vsel %vm298_vm8, %v2699_v51, %v3535_v4 }
0x1b5a   :  { %v2701_v43 = vsel %vm2666_vm13, %v2700_v46, %v2111_v61 }
0x1b5b   :  { %v3538_v37 = vpop.permute.xlu0 %3537 }
0x1b5c   :  { %v3540_v7 = vunpack.i.h.bf16 %v3538_v37  ;;  %v3539_v42 = vunpack.i.l.bf16 %v3538_v37 }
0x1b5e   :  { %v2669_v49 = vsel %vm2668_vm14, %v2667_v54, %v3539_v42  ;;  %v2702_v5 = vsel %vm2668_vm14, %v2701_v43, %v3540_v7 }
0x1b5f   :  { %v3548_v11 = vpop.permute.xlu0 %3547  ;;  %v3553_v56 = vpop.permute.xlu1 %3552  ;;  %v2703_v17 = vsel %vm2670_vm15, %v2702_v5, %v3545_v60  ;;  %v2671_v10 = vsel %vm2670_vm15, %v2669_v49, %v3544_v8 }
0x1b60   :  { %v3550_v22 = vunpack.i.h.bf16 %v3548_v11  ;;  %v3549_v23 = vunpack.i.l.bf16 %v3548_v11  ;;  %v3555_v52 = vunpack.i.h.bf16 %v3553_v56  ;;  %v3554_v9 = vunpack.i.l.bf16 %v3553_v56 }
0x1b62   :  { %v2704_v59 = vsel %vm2672_vm0, %v2703_v17, %v3550_v22  ;;  %v2673_v61 = vsel %vm2672_vm0, %v2671_v10, %v3549_v23 }
0x1b63   :  { %v2705_v18 = vsel %vm2674_vm1, %v2704_v59, %v3555_v52  ;;  %v2675_v35 = vsel %vm2674_vm1, %v2673_v61, %v3554_v9 }
0x1b64   :  { %3325 = vmatmul.mubr.f32.vlgmr.msra.gmra.mrb[26].mxu1 %v2705_v18  ;;  %3360 = vmatmul.mubr.f32.vlgmr.msra.gmra.mrb[24].mxu0 %v2675_v35 }
0x1b65   :  { %3700 = shalt.err (!%p3697_p4)
}
0x1b66   :  { %s3701_s4 = scalar_lea.hbm %s4552_s28, 32 }
0x1b67   :  { %p3702_p5 = scmp.ne.s32.totalorder %s4552_s28, %s3701_s4  ;;  %p3705_p6 = scmp.lt.u32.totalorder %s3701_s4, %s4552_s28 }
0x1b69   :  { %p3707_p7 = pnand %p3705_p6, %p3702_p5 }
0x1b6b   :  { %3710 = shalt.err (!%p3707_p7)
}
0x1b6c   :  { %2910 = dma.vmem_to_hbm [thread:$0]  %s2908_s5, 32, %s4552_s28, [#allocation6]   ;;  %vm2889_vm2 = vcmask 58368  }
0x1b6d   :  { %s3753_s30 = smov [#allocation3]  }
0x1b6e   :  { %s2897_s6 = sshll.u32 %s3753_s30, 4  ;;  %s2898_s6 = int_to_ptr.vmem [resolvable:$true] %s2897_s6 }
0x1b6f   :  { %s3711_s18 = scalar_lea.vmem %s2898_s6, 32  ;;  %p3716_p9 = scmp.lt.s32.totalorder %s2898_s6, %s2898_s6 }
0x1b70   :  { %v2886_v2 = vpop.permute.xlu0 %2885  ;;  %p3712_p8 = scmp.ne.s32.totalorder %s2898_s6, %s3711_s18  ;;  %p3717_p10 = scmp.lt.s32.totalorder %s3711_s18, %s3711_s18 }
0x1b72   :  { %p3718_p11 = por %p3717_p10, %p3716_p9 }
0x1b74   :  { %p3719_p12 = pnand %p3718_p11, %p3712_p8 }
0x1c37   :  { %v2804_v19 = vpop.f32.mrb[26].mxu1  ;;  %v2874_v55 = vpop.f32.mrb[24].mxu0 }
0x1c38   :  { %v2875_v58 = vadd.f32 %v2874_v55, %v2804_v19  ;;  %v3326_v13 = vpop.f32.mrb[27].mxu1  ;;  %v3361_v12 = vpop.f32.mrb[25].mxu0 }
0x1c3a   :  { %v2888_v21 = vadd.f32 %v2886_v2, %v2875_v58 }
0x1c3c   :  { %2890 = vst.msk [vmem:[#allocation3] sm:$0x3] %vm2889_vm2, %v2888_v21 }
0x1c3d   :  { %3722 = shalt.err (!%p3719_p12)
}
0x1c3e   :  { %s3723_s0 = scalar_lea.hbm %s4551_s27, 32 }
0x1c3f   :  { %p3724_p13 = scmp.ne.s32.totalorder %s4551_s27, %s3723_s0  ;;  %p3727_p0 = scmp.lt.u32.totalorder %s3723_s0, %s4551_s27 }
0x1c41   :  { %p3729_p1 = pnand %p3727_p0, %p3724_p13 }
0x1c43   :  { %3732 = shalt.err (!%p3729_p1)
}
0x1c44   :  { %2900 = dma.vmem_to_hbm [thread:$0]  %s2898_s6, 32, %s4551_s27, [#allocation4]  }
0x1c45   :  { %3733 = dma.done.wait [#allocation4], 32  }
0x1c46   :  { %3734 = vsyncadd [#allocation4], 4294967264 }
0x1c47   :  { %3735 = dma.done.wait [#allocation6], 32  }
0x1c48   :  { %3736 = vsyncadd [#allocation6], 4294967264 }
0x1c49   :  { %2917 = vsyncpa [#allocation4], 1 }
0x1c4a   :  { %2918 = vsyncpa [#allocation6], 1 }

</bundles_post_ra>
